<compile_context>
chip_gen: v6e
topology: v6e:2x2x1
jax: 0.10.0
libtpu: 0.0.40
codegen_flags: <defaults>
</compile_context>

<pallas_src>
import math
import numpy as np

import jax
import jax.numpy as jnp
from jax.experimental import pallas as pl
from jax.experimental.pallas import tpu as pltpu


def kernel_size_from_radius(radius):
    return int(2 * math.ceil(radius) + 1)


def gaussian_taps_1d(sigma, ksize):
    r = (ksize - 1) // 2
    xs = np.arange(-r, r + 1, dtype=np.float64)
    w = np.exp(-(xs ** 2) / (2.0 * sigma ** 2))
    return w / w.sum()


def _np_sep_blur(x, w1d, stride, pad, out_len):
    """Separable strided 1-D convs (zero pad) over the 3 trailing axes (numpy)."""
    K = len(w1d)
    nd = x.ndim
    for ax_off in range(3):
        axis = nd - 3 + ax_off
        pads = [(0, 0)] * nd
        pads[axis] = (pad, pad)
        xp = np.pad(x, pads)
        slabs = []
        for o in range(out_len):
            idx = [slice(None)] * nd
            idx[axis] = slice(stride * o, stride * o + K)
            seg = xp[tuple(idx)]
            wshape = [1] * nd
            wshape[axis] = K
            slabs.append((seg * w1d.reshape(wshape)).sum(axis=axis, keepdims=True))
        x = np.concatenate(slabs, axis=axis)
    return x


def make_antialiased_pool3d(in_spatial, *, kernel_size, stride=None, padding=0,
                            sigma=0.6):
    k = int(kernel_size)
    s = int(stride) if stride is not None else k
    # TODO(synk): nonzero pool padding (pad with -inf before max) not implemented.
    assert padding == 0
    assert (in_spatial - k) % s == 0              # check_input_shape

    pooled = in_spatial - k + 1                   # max-pool, stride 1, pad 0
    K = kernel_size_from_radius(sigma * 4.0)      # blur kernel size
    blur_pad = (K - 1) // 2 + padding             # "same" padding + rel_padding
    out_s = (pooled + 2 * blur_pad - K) // s + 1

    w1d = gaussian_taps_1d(sigma, K)
    taps = [float(v) for v in w1d]                # baked-in deterministic weights

    # Edge-correction: precompute the RECIPROCAL of blur(ones) on the host so
    # the kernel epilogue is a pure VALU multiply (no per-element EUP divide).
    denom_np = _np_sep_blur(np.ones((pooled,) * 3, np.float64), w1d, s,
                            blur_pad, out_s)
    inv_denom = jnp.asarray((1.0 / denom_np).astype(np.float32)
                            ).reshape(out_s, out_s, out_s, 1)

    D = H = W = in_spatial
    LANES = 128

    # ---------------- in-kernel helpers (static shapes, fully unrolled) -----
    def _maxpool_axis(v, axis):
        idx = [slice(None)] * v.ndim
        idx[axis] = slice(0, pooled)
        m = v[tuple(idx)]
        for t in range(1, k):
            idx[axis] = slice(t, t + pooled)
            m = jnp.maximum(m, v[tuple(idx)])
        return m

    def _zero_pad_axis(v, axis, lo, hi):
        parts = []
        if lo:
            zshape = list(v.shape); zshape[axis] = lo
            parts.append(jnp.zeros(zshape, v.dtype))
        parts.append(v)
        if hi:
            zshape = list(v.shape); zshape[axis] = hi
            parts.append(jnp.zeros(zshape, v.dtype))
        return jnp.concatenate(parts, axis=axis) if len(parts) > 1 else v

    def _blur_leading_axis(v, axis):
        # Strided Gaussian conv along a LEADING axis: zero-pad, round the axis
        # up to a multiple of the stride, split it into (q, s) (a free
        # leading-dim reshape), then each tap t = s*a + r is one unit-stride
        # slice of length out_s + one FMA.  K FMAs total, no concatenates.
        vp = _zero_pad_axis(v, axis, blur_pad, blur_pad)
        L = vp.shape[axis]
        Lr = ((L + s - 1) // s) * s
        if Lr > L:
            vp = _zero_pad_axis(vp, axis, 0, Lr - L)
        new_shape = list(vp.shape)
        new_shape[axis:axis + 1] = [Lr // s, s]
        vr = vp.reshape(new_shape)
        acc = None
        for t in range(K):
            a, r = divmod(t, s)
            idx = [slice(None)] * vr.ndim
            idx[axis] = slice(a, a + out_s)
            idx[axis + 1] = r                      # integer index -> squeezed
            term = taps[t] * vr[tuple(idx)]
            acc = term if acc is None else acc + term
        return acc

    def _blur_sublane_axis(v):
        # v: (out_s, out_s, pooled, Cb); blur along axis 2 (the sublane axis).
        # Per-output tap accumulation on lane-dense (out_s,out_s,1,Cb) slabs.
        vp = _zero_pad_axis(v, 2, blur_pad, blur_pad)
        slabs = []
        for o in range(out_s):
            acc = None
            for t in range(K):
                sl = vp[:, :, s * o + t:s * o + t + 1, :]
                term = taps[t] * sl
                acc = term if acc is None else acc + term
            slabs.append(acc)
        return jnp.concatenate(slabs, axis=2)

    def kernel(x_ref, invd_ref, o_ref):
        v = x_ref[...].astype(jnp.float32)         # (D, H, W, Cb)
        # --- MaxPool3d (kernel k, stride 1, pad 0), separable ---
        for axis in range(3):
            v = _maxpool_axis(v, axis)             # -> (P, P, P, Cb)
        # --- depthwise separable strided Gaussian blur (zero padded) ---
        v = _blur_leading_axis(v, 0)               # (out_s, P, P, Cb)
        v = _blur_leading_axis(v, 1)               # (out_s, out_s, P, Cb)
        v = _blur_sublane_axis(v)                  # (out_s, out_s, out_s, Cb)
        # --- edge correction: multiply by precomputed reciprocal ---
        o_ref[...] = (v * invd_ref[...]).astype(o_ref.dtype)

    # ---------------------------- wrapper ------------------------------------
    def apply(x):
        N, C, Din, Hin, Win = x.shape
        assert Din == Hin == Win == in_spatial
        NC = N * C

        # NCDHW -> (D, H, W, N*C): batch*channels dense on the 128-lane axis.
        xt = jnp.transpose(x, (2, 3, 4, 0, 1)).reshape(Din, Hin, Win, NC)

        if NC <= LANES:
            cblk = NC
            ncp = NC
        else:
            cblk = LANES
            ncp = ((NC + LANES - 1) // LANES) * LANES
            if ncp > NC:
                xt = jnp.pad(xt, ((0, 0), (0, 0), (0, 0), (0, ncp - NC)))
        # TODO(synk): very large spatial extents with NC > 128 would also need
        # spatial tiling; here each grid step holds full spatial in VMEM.

        in_tile_bytes = Din * Hin * Win * cblk * 4
        out_tile_bytes = (out_s ** 3) * cblk * 4
        # Stay comfortably under v7x's 64 MiB physical VMEM while raising the
        # scoped default when the tiles need it (v5e/v6e benefit from more).
        vmem_limit = int(min(48 * 2 ** 20,
                             max(16 * 2 ** 20,
                                 8 * (in_tile_bytes + out_tile_bytes))))

        out = pl.pallas_call(
            kernel,
            out_shape=jax.ShapeDtypeStruct((out_s, out_s, out_s, ncp), x.dtype),
            grid_spec=pltpu.PrefetchScalarGridSpec(
                num_scalar_prefetch=0,
                grid=(ncp // cblk,),
                in_specs=[
                    pl.BlockSpec((Din, Hin, Win, cblk),
                                 lambda i: (0, 0, 0, i)),
                    pl.BlockSpec((out_s, out_s, out_s, 1),
                                 lambda i: (0, 0, 0, 0)),
                ],
                out_specs=pl.BlockSpec((out_s, out_s, out_s, cblk),
                                       lambda i: (0, 0, 0, i)),
            ),
            compiler_params=pltpu.CompilerParams(
                dimension_semantics=("parallel",),
                vmem_limit_bytes=vmem_limit),
        )(xt, inv_denom)

        out = out[..., :NC]
        out = out.reshape(out_s, out_s, out_s, N, C).transpose(3, 4, 0, 1, 2)
        return out

    return apply, (w1d, k, s, blur_pad, out_s)


def _np_reference(x, k, w1d, stride, blur_pad, out_s):
    N, C, D, H, W = x.shape
    P = D - k + 1
    pooled = np.full((N, C, P, P, P), -np.inf, dtype=np.float64)
    for dz in range(k):
        for dy in range(k):
            for dx in range(k):
                pooled = np.maximum(
                    pooled, x[:, :, dz:dz + P, dy:dy + P, dx:dx + P])
    num = _np_sep_blur(pooled, w1d, stride, blur_pad, out_s)
    den = _np_sep_blur(np.ones((P, P, P), np.float64), w1d, stride, blur_pad, out_s)
    return (num / den).astype(np.float32)


if __name__ == "__main__":
    key = jax.random.PRNGKey(0)
    N, C, S = 2, 4, 8                      # small NCDHW input, D=H=W=8
    x = jax.random.normal(key, (N, C, S, S, S), dtype=jnp.float32)

    apply_fn, (w1d, k, s, blur_pad, out_s) = make_antialiased_pool3d(
        S, kernel_size=2, stride=None, padding=0, sigma=0.6)

    y = jax.block_until_ready(apply_fn(x))         # (2, 4, 4, 4, 4)

    y_ref = _np_reference(np.asarray(x, np.float64), k, w1d, s, blur_pad, out_s)
    np.testing.assert_allclose(np.asarray(y), y_ref, rtol=1e-4, atol=1e-5)

    print("KERNEL_OK")
</pallas_src>

<mosaic_0001>
module attributes {stable_mosaic.version = 11 : i64} {
  func.func @kernel(%arg0: i32, %arg1: memref<8x8x8x8xf32, #tpu.memory_space<vmem>>, %arg2: memref<4x4x4x1xf32, #tpu.memory_space<vmem>>, %arg3: memref<4x4x4x8xf32, #tpu.memory_space<vmem>>) attributes {dimension_semantics = [#tpu.dimension_semantics<parallel>], iteration_bounds = array<i64: 1>, scalar_prefetch = 0 : i64, scratch_operands = 0 : i64, tpu.core_type = #tpu.core_type<tc>, window_params = [{transform_indices = @transform_0, window_bounds = array<i64: 8, 8, 8, 8>}, {pipeline_mode = #tpu.pipeline_mode<synchronous>, transform_indices = @transform_1, window_bounds = array<i64: 4, 4, 4, 1>}, {transform_indices = @transform_2, window_bounds = array<i64: 4, 4, 4, 8>}]} {
    %c0 = arith.constant 0 : index
    %c0_0 = arith.constant 0 : index
    %c0_1 = arith.constant 0 : index
    %c0_2 = arith.constant 0 : index
    %0 = vector.load %arg1[%c0, %c0_0, %c0_1, %c0_2] : memref<8x8x8x8xf32, #tpu.memory_space<vmem>>, vector<8x8x8x8xf32>
    %1 = vector.extract_strided_slice %0 {offsets = [0, 0, 0, 0], sizes = [7, 8, 8, 8], strides = [1, 1, 1, 1]} : vector<8x8x8x8xf32> to vector<7x8x8x8xf32>
    %2 = vector.extract_strided_slice %0 {offsets = [1, 0, 0, 0], sizes = [7, 8, 8, 8], strides = [1, 1, 1, 1]} : vector<8x8x8x8xf32> to vector<7x8x8x8xf32>
    %3 = arith.maximumf %1, %2 : vector<7x8x8x8xf32>
    %4 = vector.extract_strided_slice %3 {offsets = [0, 0, 0, 0], sizes = [7, 7, 8, 8], strides = [1, 1, 1, 1]} : vector<7x8x8x8xf32> to vector<7x7x8x8xf32>
    %5 = vector.extract_strided_slice %3 {offsets = [0, 1, 0, 0], sizes = [7, 7, 8, 8], strides = [1, 1, 1, 1]} : vector<7x8x8x8xf32> to vector<7x7x8x8xf32>
    %6 = arith.maximumf %4, %5 : vector<7x7x8x8xf32>
    %7 = vector.extract_strided_slice %6 {offsets = [0, 0, 0, 0], sizes = [7, 7, 7, 8], strides = [1, 1, 1, 1]} : vector<7x7x8x8xf32> to vector<7x7x7x8xf32>
    %8 = vector.extract_strided_slice %6 {offsets = [0, 0, 1, 0], sizes = [7, 7, 7, 8], strides = [1, 1, 1, 1]} : vector<7x7x8x8xf32> to vector<7x7x7x8xf32>
    %9 = arith.maximumf %7, %8 : vector<7x7x7x8xf32>
    %cst = arith.constant 0.000000e+00 : f32
    %10 = vector.broadcast %cst : f32 to vector<3x7x7x8xf32>
    %cst_3 = arith.constant 0.000000e+00 : f32
    %11 = vector.broadcast %cst_3 : f32 to vector<3x7x7x8xf32>
    %12 = tpu.concatenate %10, %9, %11 in 0 : vector<3x7x7x8xf32>, vector<7x7x7x8xf32>, vector<3x7x7x8xf32> -> vector<13x7x7x8xf32>
    %cst_4 = arith.constant 0.000000e+00 : f32
    %13 = vector.broadcast %cst_4 : f32 to vector<1x7x7x8xf32>
    %14 = tpu.concatenate %12, %13 in 0 : vector<13x7x7x8xf32>, vector<1x7x7x8xf32> -> vector<14x7x7x8xf32>
    %15 = vector.shape_cast %14 : vector<14x7x7x8xf32> to vector<7x2x7x7x8xf32>
    %16 = vector.extract_strided_slice %15 {offsets = [0, 0, 0, 0, 0], sizes = [4, 1, 7, 7, 8], strides = [1, 1, 1, 1, 1]} : vector<7x2x7x7x8xf32> to vector<4x1x7x7x8xf32>
    %17 = vector.shape_cast %16 : vector<4x1x7x7x8xf32> to vector<4x7x7x8xf32>
    %cst_5 = arith.constant 2.47380854E-6 : f32
    %18 = vector.broadcast %cst_5 : f32 to vector<4x7x7x8xf32>
    %19 = arith.mulf %18, %17 : vector<4x7x7x8xf32>
    %20 = vector.extract_strided_slice %15 {offsets = [0, 1, 0, 0, 0], sizes = [4, 1, 7, 7, 8], strides = [1, 1, 1, 1, 1]} : vector<7x2x7x7x8xf32> to vector<4x1x7x7x8xf32>
    %21 = vector.shape_cast %20 : vector<4x1x7x7x8xf32> to vector<4x7x7x8xf32>
    %cst_6 = arith.constant 0.00256625586 : f32
    %22 = vector.broadcast %cst_6 : f32 to vector<4x7x7x8xf32>
    %23 = arith.mulf %22, %21 : vector<4x7x7x8xf32>
    %24 = arith.addf %19, %23 : vector<4x7x7x8xf32>
    %25 = vector.extract_strided_slice %15 {offsets = [1, 0, 0, 0, 0], sizes = [4, 1, 7, 7, 8], strides = [1, 1, 1, 1, 1]} : vector<7x2x7x7x8xf32> to vector<4x1x7x7x8xf32>
    %26 = vector.shape_cast %25 : vector<4x1x7x7x8xf32> to vector<4x7x7x8xf32>
    %cst_7 = arith.constant 0.165523753 : f32
    %27 = vector.broadcast %cst_7 : f32 to vector<4x7x7x8xf32>
    %28 = arith.mulf %27, %26 : vector<4x7x7x8xf32>
    %29 = arith.addf %24, %28 : vector<4x7x7x8xf32>
    %30 = vector.extract_strided_slice %15 {offsets = [1, 1, 0, 0, 0], sizes = [4, 1, 7, 7, 8], strides = [1, 1, 1, 1, 1]} : vector<7x2x7x7x8xf32> to vector<4x1x7x7x8xf32>
    %31 = vector.shape_cast %30 : vector<4x1x7x7x8xf32> to vector<4x7x7x8xf32>
    %cst_8 = arith.constant 6.638150e-01 : f32
    %32 = vector.broadcast %cst_8 : f32 to vector<4x7x7x8xf32>
    %33 = arith.mulf %32, %31 : vector<4x7x7x8xf32>
    %34 = arith.addf %29, %33 : vector<4x7x7x8xf32>
    %35 = vector.extract_strided_slice %15 {offsets = [2, 0, 0, 0, 0], sizes = [4, 1, 7, 7, 8], strides = [1, 1, 1, 1, 1]} : vector<7x2x7x7x8xf32> to vector<4x1x7x7x8xf32>
    %36 = vector.shape_cast %35 : vector<4x1x7x7x8xf32> to vector<4x7x7x8xf32>
    %cst_9 = arith.constant 0.165523753 : f32
    %37 = vector.broadcast %cst_9 : f32 to vector<4x7x7x8xf32>
    %38 = arith.mulf %37, %36 : vector<4x7x7x8xf32>
    %39 = arith.addf %34, %38 : vector<4x7x7x8xf32>
    %40 = vector.extract_strided_slice %15 {offsets = [2, 1, 0, 0, 0], sizes = [4, 1, 7, 7, 8], strides = [1, 1, 1, 1, 1]} : vector<7x2x7x7x8xf32> to vector<4x1x7x7x8xf32>
    %41 = vector.shape_cast %40 : vector<4x1x7x7x8xf32> to vector<4x7x7x8xf32>
    %cst_10 = arith.constant 0.00256625586 : f32
    %42 = vector.broadcast %cst_10 : f32 to vector<4x7x7x8xf32>
    %43 = arith.mulf %42, %41 : vector<4x7x7x8xf32>
    %44 = arith.addf %39, %43 : vector<4x7x7x8xf32>
    %45 = vector.extract_strided_slice %15 {offsets = [3, 0, 0, 0, 0], sizes = [4, 1, 7, 7, 8], strides = [1, 1, 1, 1, 1]} : vector<7x2x7x7x8xf32> to vector<4x1x7x7x8xf32>
    %46 = vector.shape_cast %45 : vector<4x1x7x7x8xf32> to vector<4x7x7x8xf32>
    %cst_11 = arith.constant 2.47380854E-6 : f32
    %47 = vector.broadcast %cst_11 : f32 to vector<4x7x7x8xf32>
    %48 = arith.mulf %47, %46 : vector<4x7x7x8xf32>
    %49 = arith.addf %44, %48 : vector<4x7x7x8xf32>
    %cst_12 = arith.constant 0.000000e+00 : f32
    %50 = vector.broadcast %cst_12 : f32 to vector<4x3x7x8xf32>
    %cst_13 = arith.constant 0.000000e+00 : f32
    %51 = vector.broadcast %cst_13 : f32 to vector<4x3x7x8xf32>
    %52 = tpu.concatenate %50, %49, %51 in 1 : vector<4x3x7x8xf32>, vector<4x7x7x8xf32>, vector<4x3x7x8xf32> -> vector<4x13x7x8xf32>
    %cst_14 = arith.constant 0.000000e+00 : f32
    %53 = vector.broadcast %cst_14 : f32 to vector<4x1x7x8xf32>
    %54 = tpu.concatenate %52, %53 in 1 : vector<4x13x7x8xf32>, vector<4x1x7x8xf32> -> vector<4x14x7x8xf32>
    %55 = vector.shape_cast %54 : vector<4x14x7x8xf32> to vector<4x7x2x7x8xf32>
    %56 = vector.extract_strided_slice %55 {offsets = [0, 0, 0, 0, 0], sizes = [4, 4, 1, 7, 8], strides = [1, 1, 1, 1, 1]} : vector<4x7x2x7x8xf32> to vector<4x4x1x7x8xf32>
    %57 = vector.shape_cast %56 : vector<4x4x1x7x8xf32> to vector<4x4x7x8xf32>
    %cst_15 = arith.constant 2.47380854E-6 : f32
    %58 = vector.broadcast %cst_15 : f32 to vector<4x4x7x8xf32>
    %59 = arith.mulf %58, %57 : vector<4x4x7x8xf32>
    %60 = vector.extract_strided_slice %55 {offsets = [0, 0, 1, 0, 0], sizes = [4, 4, 1, 7, 8], strides = [1, 1, 1, 1, 1]} : vector<4x7x2x7x8xf32> to vector<4x4x1x7x8xf32>
    %61 = vector.shape_cast %60 : vector<4x4x1x7x8xf32> to vector<4x4x7x8xf32>
    %cst_16 = arith.constant 0.00256625586 : f32
    %62 = vector.broadcast %cst_16 : f32 to vector<4x4x7x8xf32>
    %63 = arith.mulf %62, %61 : vector<4x4x7x8xf32>
    %64 = arith.addf %59, %63 : vector<4x4x7x8xf32>
    %65 = vector.extract_strided_slice %55 {offsets = [0, 1, 0, 0, 0], sizes = [4, 4, 1, 7, 8], strides = [1, 1, 1, 1, 1]} : vector<4x7x2x7x8xf32> to vector<4x4x1x7x8xf32>
    %66 = vector.shape_cast %65 : vector<4x4x1x7x8xf32> to vector<4x4x7x8xf32>
    %cst_17 = arith.constant 0.165523753 : f32
    %67 = vector.broadcast %cst_17 : f32 to vector<4x4x7x8xf32>
    %68 = arith.mulf %67, %66 : vector<4x4x7x8xf32>
    %69 = arith.addf %64, %68 : vector<4x4x7x8xf32>
    %70 = vector.extract_strided_slice %55 {offsets = [0, 1, 1, 0, 0], sizes = [4, 4, 1, 7, 8], strides = [1, 1, 1, 1, 1]} : vector<4x7x2x7x8xf32> to vector<4x4x1x7x8xf32>
    %71 = vector.shape_cast %70 : vector<4x4x1x7x8xf32> to vector<4x4x7x8xf32>
    %cst_18 = arith.constant 6.638150e-01 : f32
    %72 = vector.broadcast %cst_18 : f32 to vector<4x4x7x8xf32>
    %73 = arith.mulf %72, %71 : vector<4x4x7x8xf32>
    %74 = arith.addf %69, %73 : vector<4x4x7x8xf32>
    %75 = vector.extract_strided_slice %55 {offsets = [0, 2, 0, 0, 0], sizes = [4, 4, 1, 7, 8], strides = [1, 1, 1, 1, 1]} : vector<4x7x2x7x8xf32> to vector<4x4x1x7x8xf32>
    %76 = vector.shape_cast %75 : vector<4x4x1x7x8xf32> to vector<4x4x7x8xf32>
    %cst_19 = arith.constant 0.165523753 : f32
    %77 = vector.broadcast %cst_19 : f32 to vector<4x4x7x8xf32>
    %78 = arith.mulf %77, %76 : vector<4x4x7x8xf32>
    %79 = arith.addf %74, %78 : vector<4x4x7x8xf32>
    %80 = vector.extract_strided_slice %55 {offsets = [0, 2, 1, 0, 0], sizes = [4, 4, 1, 7, 8], strides = [1, 1, 1, 1, 1]} : vector<4x7x2x7x8xf32> to vector<4x4x1x7x8xf32>
    %81 = vector.shape_cast %80 : vector<4x4x1x7x8xf32> to vector<4x4x7x8xf32>
    %cst_20 = arith.constant 0.00256625586 : f32
    %82 = vector.broadcast %cst_20 : f32 to vector<4x4x7x8xf32>
    %83 = arith.mulf %82, %81 : vector<4x4x7x8xf32>
    %84 = arith.addf %79, %83 : vector<4x4x7x8xf32>
    %85 = vector.extract_strided_slice %55 {offsets = [0, 3, 0, 0, 0], sizes = [4, 4, 1, 7, 8], strides = [1, 1, 1, 1, 1]} : vector<4x7x2x7x8xf32> to vector<4x4x1x7x8xf32>
    %86 = vector.shape_cast %85 : vector<4x4x1x7x8xf32> to vector<4x4x7x8xf32>
    %cst_21 = arith.constant 2.47380854E-6 : f32
    %87 = vector.broadcast %cst_21 : f32 to vector<4x4x7x8xf32>
    %88 = arith.mulf %87, %86 : vector<4x4x7x8xf32>
    %89 = arith.addf %84, %88 : vector<4x4x7x8xf32>
    %cst_22 = arith.constant 0.000000e+00 : f32
    %90 = vector.broadcast %cst_22 : f32 to vector<4x4x3x8xf32>
    %cst_23 = arith.constant 0.000000e+00 : f32
    %91 = vector.broadcast %cst_23 : f32 to vector<4x4x3x8xf32>
    %92 = tpu.concatenate %90, %89, %91 in 2 : vector<4x4x3x8xf32>, vector<4x4x7x8xf32>, vector<4x4x3x8xf32> -> vector<4x4x13x8xf32>
    %93 = vector.extract_strided_slice %92 {offsets = [0, 0, 0, 0], sizes = [4, 4, 1, 8], strides = [1, 1, 1, 1]} : vector<4x4x13x8xf32> to vector<4x4x1x8xf32>
    %cst_24 = arith.constant 2.47380854E-6 : f32
    %94 = vector.broadcast %cst_24 : f32 to vector<4x4x1x8xf32>
    %95 = arith.mulf %94, %93 : vector<4x4x1x8xf32>
    %96 = vector.extract_strided_slice %92 {offsets = [0, 0, 1, 0], sizes = [4, 4, 1, 8], strides = [1, 1, 1, 1]} : vector<4x4x13x8xf32> to vector<4x4x1x8xf32>
    %cst_25 = arith.constant 0.00256625586 : f32
    %97 = vector.broadcast %cst_25 : f32 to vector<4x4x1x8xf32>
    %98 = arith.mulf %97, %96 : vector<4x4x1x8xf32>
    %99 = arith.addf %95, %98 : vector<4x4x1x8xf32>
    %100 = vector.extract_strided_slice %92 {offsets = [0, 0, 2, 0], sizes = [4, 4, 1, 8], strides = [1, 1, 1, 1]} : vector<4x4x13x8xf32> to vector<4x4x1x8xf32>
    %cst_26 = arith.constant 0.165523753 : f32
    %101 = vector.broadcast %cst_26 : f32 to vector<4x4x1x8xf32>
    %102 = arith.mulf %101, %100 : vector<4x4x1x8xf32>
    %103 = arith.addf %99, %102 : vector<4x4x1x8xf32>
    %104 = vector.extract_strided_slice %92 {offsets = [0, 0, 3, 0], sizes = [4, 4, 1, 8], strides = [1, 1, 1, 1]} : vector<4x4x13x8xf32> to vector<4x4x1x8xf32>
    %cst_27 = arith.constant 6.638150e-01 : f32
    %105 = vector.broadcast %cst_27 : f32 to vector<4x4x1x8xf32>
    %106 = arith.mulf %105, %104 : vector<4x4x1x8xf32>
    %107 = arith.addf %103, %106 : vector<4x4x1x8xf32>
    %108 = vector.extract_strided_slice %92 {offsets = [0, 0, 4, 0], sizes = [4, 4, 1, 8], strides = [1, 1, 1, 1]} : vector<4x4x13x8xf32> to vector<4x4x1x8xf32>
    %cst_28 = arith.constant 0.165523753 : f32
    %109 = vector.broadcast %cst_28 : f32 to vector<4x4x1x8xf32>
    %110 = arith.mulf %109, %108 : vector<4x4x1x8xf32>
    %111 = arith.addf %107, %110 : vector<4x4x1x8xf32>
    %112 = vector.extract_strided_slice %92 {offsets = [0, 0, 5, 0], sizes = [4, 4, 1, 8], strides = [1, 1, 1, 1]} : vector<4x4x13x8xf32> to vector<4x4x1x8xf32>
    %cst_29 = arith.constant 0.00256625586 : f32
    %113 = vector.broadcast %cst_29 : f32 to vector<4x4x1x8xf32>
    %114 = arith.mulf %113, %112 : vector<4x4x1x8xf32>
    %115 = arith.addf %111, %114 : vector<4x4x1x8xf32>
    %116 = vector.extract_strided_slice %92 {offsets = [0, 0, 6, 0], sizes = [4, 4, 1, 8], strides = [1, 1, 1, 1]} : vector<4x4x13x8xf32> to vector<4x4x1x8xf32>
    %cst_30 = arith.constant 2.47380854E-6 : f32
    %117 = vector.broadcast %cst_30 : f32 to vector<4x4x1x8xf32>
    %118 = arith.mulf %117, %116 : vector<4x4x1x8xf32>
    %119 = arith.addf %115, %118 : vector<4x4x1x8xf32>
    %120 = vector.extract_strided_slice %92 {offsets = [0, 0, 2, 0], sizes = [4, 4, 1, 8], strides = [1, 1, 1, 1]} : vector<4x4x13x8xf32> to vector<4x4x1x8xf32>
    %cst_31 = arith.constant 2.47380854E-6 : f32
    %121 = vector.broadcast %cst_31 : f32 to vector<4x4x1x8xf32>
    %122 = arith.mulf %121, %120 : vector<4x4x1x8xf32>
    %123 = vector.extract_strided_slice %92 {offsets = [0, 0, 3, 0], sizes = [4, 4, 1, 8], strides = [1, 1, 1, 1]} : vector<4x4x13x8xf32> to vector<4x4x1x8xf32>
    %cst_32 = arith.constant 0.00256625586 : f32
    %124 = vector.broadcast %cst_32 : f32 to vector<4x4x1x8xf32>
    %125 = arith.mulf %124, %123 : vector<4x4x1x8xf32>
    %126 = arith.addf %122, %125 : vector<4x4x1x8xf32>
    %127 = vector.extract_strided_slice %92 {offsets = [0, 0, 4, 0], sizes = [4, 4, 1, 8], strides = [1, 1, 1, 1]} : vector<4x4x13x8xf32> to vector<4x4x1x8xf32>
    %cst_33 = arith.constant 0.165523753 : f32
    %128 = vector.broadcast %cst_33 : f32 to vector<4x4x1x8xf32>
    %129 = arith.mulf %128, %127 : vector<4x4x1x8xf32>
    %130 = arith.addf %126, %129 : vector<4x4x1x8xf32>
    %131 = vector.extract_strided_slice %92 {offsets = [0, 0, 5, 0], sizes = [4, 4, 1, 8], strides = [1, 1, 1, 1]} : vector<4x4x13x8xf32> to vector<4x4x1x8xf32>
    %cst_34 = arith.constant 6.638150e-01 : f32
    %132 = vector.broadcast %cst_34 : f32 to vector<4x4x1x8xf32>
    %133 = arith.mulf %132, %131 : vector<4x4x1x8xf32>
    %134 = arith.addf %130, %133 : vector<4x4x1x8xf32>
    %135 = vector.extract_strided_slice %92 {offsets = [0, 0, 6, 0], sizes = [4, 4, 1, 8], strides = [1, 1, 1, 1]} : vector<4x4x13x8xf32> to vector<4x4x1x8xf32>
    %cst_35 = arith.constant 0.165523753 : f32
    %136 = vector.broadcast %cst_35 : f32 to vector<4x4x1x8xf32>
    %137 = arith.mulf %136, %135 : vector<4x4x1x8xf32>
    %138 = arith.addf %134, %137 : vector<4x4x1x8xf32>
    %139 = vector.extract_strided_slice %92 {offsets = [0, 0, 7, 0], sizes = [4, 4, 1, 8], strides = [1, 1, 1, 1]} : vector<4x4x13x8xf32> to vector<4x4x1x8xf32>
    %cst_36 = arith.constant 0.00256625586 : f32
    %140 = vector.broadcast %cst_36 : f32 to vector<4x4x1x8xf32>
    %141 = arith.mulf %140, %139 : vector<4x4x1x8xf32>
    %142 = arith.addf %138, %141 : vector<4x4x1x8xf32>
    %143 = vector.extract_strided_slice %92 {offsets = [0, 0, 8, 0], sizes = [4, 4, 1, 8], strides = [1, 1, 1, 1]} : vector<4x4x13x8xf32> to vector<4x4x1x8xf32>
    %cst_37 = arith.constant 2.47380854E-6 : f32
    %144 = vector.broadcast %cst_37 : f32 to vector<4x4x1x8xf32>
    %145 = arith.mulf %144, %143 : vector<4x4x1x8xf32>
    %146 = arith.addf %142, %145 : vector<4x4x1x8xf32>
    %147 = vector.extract_strided_slice %92 {offsets = [0, 0, 4, 0], sizes = [4, 4, 1, 8], strides = [1, 1, 1, 1]} : vector<4x4x13x8xf32> to vector<4x4x1x8xf32>
    %cst_38 = arith.constant 2.47380854E-6 : f32
    %148 = vector.broadcast %cst_38 : f32 to vector<4x4x1x8xf32>
    %149 = arith.mulf %148, %147 : vector<4x4x1x8xf32>
    %150 = vector.extract_strided_slice %92 {offsets = [0, 0, 5, 0], sizes = [4, 4, 1, 8], strides = [1, 1, 1, 1]} : vector<4x4x13x8xf32> to vector<4x4x1x8xf32>
    %cst_39 = arith.constant 0.00256625586 : f32
    %151 = vector.broadcast %cst_39 : f32 to vector<4x4x1x8xf32>
    %152 = arith.mulf %151, %150 : vector<4x4x1x8xf32>
    %153 = arith.addf %149, %152 : vector<4x4x1x8xf32>
    %154 = vector.extract_strided_slice %92 {offsets = [0, 0, 6, 0], sizes = [4, 4, 1, 8], strides = [1, 1, 1, 1]} : vector<4x4x13x8xf32> to vector<4x4x1x8xf32>
    %cst_40 = arith.constant 0.165523753 : f32
    %155 = vector.broadcast %cst_40 : f32 to vector<4x4x1x8xf32>
    %156 = arith.mulf %155, %154 : vector<4x4x1x8xf32>
    %157 = arith.addf %153, %156 : vector<4x4x1x8xf32>
    %158 = vector.extract_strided_slice %92 {offsets = [0, 0, 7, 0], sizes = [4, 4, 1, 8], strides = [1, 1, 1, 1]} : vector<4x4x13x8xf32> to vector<4x4x1x8xf32>
    %cst_41 = arith.constant 6.638150e-01 : f32
    %159 = vector.broadcast %cst_41 : f32 to vector<4x4x1x8xf32>
    %160 = arith.mulf %159, %158 : vector<4x4x1x8xf32>
    %161 = arith.addf %157, %160 : vector<4x4x1x8xf32>
    %162 = vector.extract_strided_slice %92 {offsets = [0, 0, 8, 0], sizes = [4, 4, 1, 8], strides = [1, 1, 1, 1]} : vector<4x4x13x8xf32> to vector<4x4x1x8xf32>
    %cst_42 = arith.constant 0.165523753 : f32
    %163 = vector.broadcast %cst_42 : f32 to vector<4x4x1x8xf32>
    %164 = arith.mulf %163, %162 : vector<4x4x1x8xf32>
    %165 = arith.addf %161, %164 : vector<4x4x1x8xf32>
    %166 = vector.extract_strided_slice %92 {offsets = [0, 0, 9, 0], sizes = [4, 4, 1, 8], strides = [1, 1, 1, 1]} : vector<4x4x13x8xf32> to vector<4x4x1x8xf32>
    %cst_43 = arith.constant 0.00256625586 : f32
    %167 = vector.broadcast %cst_43 : f32 to vector<4x4x1x8xf32>
    %168 = arith.mulf %167, %166 : vector<4x4x1x8xf32>
    %169 = arith.addf %165, %168 : vector<4x4x1x8xf32>
    %170 = vector.extract_strided_slice %92 {offsets = [0, 0, 10, 0], sizes = [4, 4, 1, 8], strides = [1, 1, 1, 1]} : vector<4x4x13x8xf32> to vector<4x4x1x8xf32>
    %cst_44 = arith.constant 2.47380854E-6 : f32
    %171 = vector.broadcast %cst_44 : f32 to vector<4x4x1x8xf32>
    %172 = arith.mulf %171, %170 : vector<4x4x1x8xf32>
    %173 = arith.addf %169, %172 : vector<4x4x1x8xf32>
    %174 = vector.extract_strided_slice %92 {offsets = [0, 0, 6, 0], sizes = [4, 4, 1, 8], strides = [1, 1, 1, 1]} : vector<4x4x13x8xf32> to vector<4x4x1x8xf32>
    %cst_45 = arith.constant 2.47380854E-6 : f32
    %175 = vector.broadcast %cst_45 : f32 to vector<4x4x1x8xf32>
    %176 = arith.mulf %175, %174 : vector<4x4x1x8xf32>
    %177 = vector.extract_strided_slice %92 {offsets = [0, 0, 7, 0], sizes = [4, 4, 1, 8], strides = [1, 1, 1, 1]} : vector<4x4x13x8xf32> to vector<4x4x1x8xf32>
    %cst_46 = arith.constant 0.00256625586 : f32
    %178 = vector.broadcast %cst_46 : f32 to vector<4x4x1x8xf32>
    %179 = arith.mulf %178, %177 : vector<4x4x1x8xf32>
    %180 = arith.addf %176, %179 : vector<4x4x1x8xf32>
    %181 = vector.extract_strided_slice %92 {offsets = [0, 0, 8, 0], sizes = [4, 4, 1, 8], strides = [1, 1, 1, 1]} : vector<4x4x13x8xf32> to vector<4x4x1x8xf32>
    %cst_47 = arith.constant 0.165523753 : f32
    %182 = vector.broadcast %cst_47 : f32 to vector<4x4x1x8xf32>
    %183 = arith.mulf %182, %181 : vector<4x4x1x8xf32>
    %184 = arith.addf %180, %183 : vector<4x4x1x8xf32>
    %185 = vector.extract_strided_slice %92 {offsets = [0, 0, 9, 0], sizes = [4, 4, 1, 8], strides = [1, 1, 1, 1]} : vector<4x4x13x8xf32> to vector<4x4x1x8xf32>
    %cst_48 = arith.constant 6.638150e-01 : f32
    %186 = vector.broadcast %cst_48 : f32 to vector<4x4x1x8xf32>
    %187 = arith.mulf %186, %185 : vector<4x4x1x8xf32>
    %188 = arith.addf %184, %187 : vector<4x4x1x8xf32>
    %189 = vector.extract_strided_slice %92 {offsets = [0, 0, 10, 0], sizes = [4, 4, 1, 8], strides = [1, 1, 1, 1]} : vector<4x4x13x8xf32> to vector<4x4x1x8xf32>
    %cst_49 = arith.constant 0.165523753 : f32
    %190 = vector.broadcast %cst_49 : f32 to vector<4x4x1x8xf32>
    %191 = arith.mulf %190, %189 : vector<4x4x1x8xf32>
    %192 = arith.addf %188, %191 : vector<4x4x1x8xf32>
    %193 = vector.extract_strided_slice %92 {offsets = [0, 0, 11, 0], sizes = [4, 4, 1, 8], strides = [1, 1, 1, 1]} : vector<4x4x13x8xf32> to vector<4x4x1x8xf32>
    %cst_50 = arith.constant 0.00256625586 : f32
    %194 = vector.broadcast %cst_50 : f32 to vector<4x4x1x8xf32>
    %195 = arith.mulf %194, %193 : vector<4x4x1x8xf32>
    %196 = arith.addf %192, %195 : vector<4x4x1x8xf32>
    %197 = vector.extract_strided_slice %92 {offsets = [0, 0, 12, 0], sizes = [4, 4, 1, 8], strides = [1, 1, 1, 1]} : vector<4x4x13x8xf32> to vector<4x4x1x8xf32>
    %cst_51 = arith.constant 2.47380854E-6 : f32
    %198 = vector.broadcast %cst_51 : f32 to vector<4x4x1x8xf32>
    %199 = arith.mulf %198, %197 : vector<4x4x1x8xf32>
    %200 = arith.addf %196, %199 : vector<4x4x1x8xf32>
    %201 = tpu.concatenate %119, %146, %173, %200 in 2 : vector<4x4x1x8xf32>, vector<4x4x1x8xf32>, vector<4x4x1x8xf32>, vector<4x4x1x8xf32> -> vector<4x4x4x8xf32>
    %c0_52 = arith.constant 0 : index
    %c0_53 = arith.constant 0 : index
    %c0_54 = arith.constant 0 : index
    %c0_55 = arith.constant 0 : index
    %202 = vector.load %arg2[%c0_52, %c0_53, %c0_54, %c0_55] : memref<4x4x4x1xf32, #tpu.memory_space<vmem>>, vector<4x4x4x1xf32>
    %203 = vector.broadcast %202 : vector<4x4x4x1xf32> to vector<4x4x4x8xf32>
    %204 = arith.mulf %201, %203 : vector<4x4x4x8xf32>
    %c0_56 = arith.constant 0 : index
    %c0_57 = arith.constant 0 : index
    %c0_58 = arith.constant 0 : index
    %c0_59 = arith.constant 0 : index
    %205 = vector.load %arg3[%c0_56, %c0_57, %c0_58, %c0_59] : memref<4x4x4x8xf32, #tpu.memory_space<vmem>>, vector<4x4x4x8xf32>
    tpu.vector_store %arg3[%c0_56, %c0_57, %c0_58, %c0_59], %204 {strides = array<i32>} : memref<4x4x4x8xf32, #tpu.memory_space<vmem>>, vector<4x4x4x8xf32>,
    return
  }
  func.func @transform_0(%arg0: i32) -> (i32, i32, i32, i32) {
    %c0_i32 = arith.constant 0 : i32
    %c0_i32_0 = arith.constant 0 : i32
    %c0_i32_1 = arith.constant 0 : i32
    %c0_i32_2 = arith.constant 0 : i32
    return %c0_i32, %c0_i32_0, %c0_i32_1, %arg0 : i32, i32, i32, i32
  }
  func.func @transform_1(%arg0: i32) -> (i32, i32, i32, i32) {
    %c0_i32 = arith.constant 0 : i32
    %c0_i32_0 = arith.constant 0 : i32
    %c0_i32_1 = arith.constant 0 : i32
    %c0_i32_2 = arith.constant 0 : i32
    %c0_i32_3 = arith.constant 0 : i32
    return %c0_i32, %c0_i32_0, %c0_i32_1, %c0_i32_2 : i32, i32, i32, i32
  }
  func.func @transform_2(%arg0: i32) -> (i32, i32, i32, i32) {
    %c0_i32 = arith.constant 0 : i32
    %c0_i32_0 = arith.constant 0 : i32
    %c0_i32_1 = arith.constant 0 : i32
    %c0_i32_2 = arith.constant 0 : i32
    return %c0_i32, %c0_i32_0, %c0_i32_1, %arg0 : i32, i32, i32, i32
  }
}

</mosaic_0001>

<bundles_post_ra>
// kernel: tpu_custom_call.1
= control target key start
LH: loop header
LB: loop body
LE: loop exit
PB: predicated region body
PF: predicated region fallthrough
CT: control target
= control target key end

     0   :  { %7 = vsyncpa [#allocation3], 0  ;;  %s2966_s0 = inlined_call_operand.hbm [shape: f32[8,8,8,8], index: 0, kind: input, shape index: {}]   ;;  %s2967_s1 = inlined_call_operand.vmem [shape: f32[4,4,4,1], index: 1, kind: input, shape index: {}]   ;;  %s2968_s2 = inlined_call_operand.hbm [shape: f32[4,4,4,8], index: 2, kind: output, shape index: {}]  }
   0x1   :  { %8 = vsyncpa [#allocation4], 0  ;;  %s2109_s9 = smov [#allocation2]  }
   0x2   :  { %s14_s10 = sshll.u32 %s2109_s9, 4  ;;  %s15_s10 = int_to_ptr.vmem [resolvable:$true] %s14_s10 }
   0x3   :  { %s2073_s11 = scalar_lea.vmem %s15_s10, 8192  ;;  %p2078_p1 = scmp.lt.s32.totalorder %s15_s10, %s15_s10 }
   0x4   :  { %p2074_p0 = scmp.ne.s32.totalorder %s15_s10, %s2073_s11  ;;  %p2079_p2 = scmp.lt.s32.totalorder %s2073_s11, %s2073_s11 }
   0x6   :  { %p2080_p3 = por %p2079_p2, %p2078_p1 }
   0x8   :  { %p2081_p4 = pnand %p2080_p3, %p2074_p0 }
   0xa   :  { %2084 = shalt.err (!%p2081_p4)
}
   0xb   :  { %s2110_s12 = smov 128   ;;  %s2111_s13 = smov 8  }
   0xc   :  { %20 = dma.hbm_to_vmem [thread:$0]  %s2966_s0, 8192, %s15_s10, [#allocation3], %s2110_s12, %s2110_s12, %s2111_s13  }
   0xd   :  { %2105 = dma.done.wait [#allocation3], 8192  }
   0xe   :  { %2106 = vsyncadd [#allocation3], 4294959104  ;;  %v2112_v0 = vmov 0   ;;  %v1912_v1 = vld [vmem:[%s2967_s1 + $0x8] sm:$0xf]  ;;  %v28_v8 = vld [vmem:[#allocation2 + $0x10] sm:$0xff] }
   0xf   :  { %2064 = vset.pattern.permute.xlu1 %v2112_v0  ;;  %2063 = vset.pattern.permute.xlu0 %v2112_v0  ;;  %v1910_v2 = vld [vmem:[%s2967_s1] sm:$0xf]  ;;  %v1913_v3 = vld [vmem:[%s2967_s1 + $0xc] sm:$0xf]  ;;  %v1911_v4 = vld [vmem:[%s2967_s1 + $0x4] sm:$0xf] }
  0x10   :  { %1938 = vperm.xlu1 %2064, %v1912_v1   ;;  %1928 = vperm.xlu0 %2063, %v1910_v2   ;;  %v1915_v5 = vld [vmem:[%s2967_s1 + $0x14] sm:$0xf]  ;;  %v1914_v6 = vld [vmem:[%s2967_s1 + $0x10] sm:$0xf]  ;;  %v27_v7 = vld [vmem:[#allocation2 + $0x8] sm:$0xff]  ;;  %vm835_vm0 = vcmask 1042432  }
  0x11   :  { %v29_v9 = vld [vmem:[#allocation2 + $0x18] sm:$0xff]  ;;  %v30_v10 = vld [vmem:[#allocation2 + $0x20] sm:$0xff]  ;;  %v31_v11 = vld [vmem:[#allocation2 + $0x28] sm:$0xff]  ;;  %vm852_vm1 = vcmask 1041408   ;;  %vm1861_vm2 = vcmask 1040384   ;;  %vm2022_vm3 = vcmask 60416  }
  0x12   :  { %v32_v12 = vld [vmem:[#allocation2 + $0x30] sm:$0xff]  ;;  %v2152_v13 = vld [vmem:[#allocation2 + $0x38] sm:$0xff]  ;;  %v35_v14 = vld [vmem:[#allocation2 + $0x48] sm:$0xff] }
  0x13   :  { %v1917_v15 = vld [vmem:[%s2967_s1 + $0x1c] sm:$0xf]  ;;  %v1916_v16 = vld [vmem:[%s2967_s1 + $0x18] sm:$0xf]  ;;  %v36_v17 = vld [vmem:[#allocation2 + $0x50] sm:$0xff]  ;;  %v2160_v20 = vmax.f32 %v27_v7, %v35_v14 }
  0x14   :  { %1943 = vperm.xlu1 %2064, %v1913_v3   ;;  %1933 = vperm.xlu0 %2063, %v1911_v4   ;;  %v37_v18 = vld [vmem:[#allocation2 + $0x58] sm:$0xff]  ;;  %v38_v19 = vld [vmem:[#allocation2 + $0x60] sm:$0xff]  ;;  %v39_v21 = vld [vmem:[#allocation2 + $0x68] sm:$0xff]  ;;  %v92_v24 = vmax.f32 %v28_v8, %v36_v17 }
  0x15   :  { %v40_v22 = vld [vmem:[#allocation2 + $0x70] sm:$0xff]  ;;  %v2162_v23 = vld [vmem:[#allocation2 + $0x78] sm:$0xff]  ;;  %v93_v25 = vmax.f32 %v29_v9, %v37_v18  ;;  %v43_v26 = vld [vmem:[#allocation2 + $0x88] sm:$0xff]  ;;  %v94_v29 = vmax.f32 %v30_v10, %v38_v19  ;;  %v95_v30 = vmax.f32 %v31_v11, %v39_v21 }
  0x16   :  { %v44_v27 = vld [vmem:[#allocation2 + $0x90] sm:$0xff]  ;;  %v45_v28 = vld [vmem:[#allocation2 + $0x98] sm:$0xff]  ;;  %v96_v31 = vmax.f32 %v32_v12, %v40_v22  ;;  %v97_v32 = vmax.f32 %v2152_v13, %v2162_v23  ;;  %v46_v33 = vld [vmem:[#allocation2 + $0xa0] sm:$0xff]  ;;  %v2166_v36 = vmax.f32 %v35_v14, %v43_v26  ;;  %v2169_v39 = vmax.f32 %v2160_v20, %v92_v24 }
  0x17   :  { %v47_v34 = vld [vmem:[#allocation2 + $0xa8] sm:$0xff]  ;;  %v48_v35 = vld [vmem:[#allocation2 + $0xb0] sm:$0xff]  ;;  %v100_v37 = vmax.f32 %v36_v17, %v44_v27  ;;  %v101_v38 = vmax.f32 %v37_v18, %v45_v28  ;;  %v1919_v40 = vld [vmem:[%s2967_s1 + $0x24] sm:$0xf]  ;;  %v102_v45 = vmax.f32 %v38_v19, %v46_v33  ;;  %v2177_v48 = vmax.f32 %v92_v24, %v93_v25 }
  0x18   :  { %1953 = vperm.xlu1 %2064, %v1915_v5   ;;  %1948 = vperm.xlu0 %2063, %v1914_v6   ;;  %v1918_v41 = vld [vmem:[%s2967_s1 + $0x20] sm:$0xf]  ;;  %v49_v42 = vld [vmem:[#allocation2 + $0xb8] sm:$0xff]  ;;  %v51_v43 = vld [vmem:[#allocation2 + $0xc8] sm:$0xff]  ;;  %v103_v46 = vmax.f32 %v39_v21, %v47_v34  ;;  %v104_v47 = vmax.f32 %v40_v22, %v48_v35  ;;  %v2184_v61 = vmax.f32 %v93_v25, %v94_v29 }
  0x19   :  { %v52_v44 = vld [vmem:[#allocation2 + $0xd0] sm:$0xff]  ;;  %v53_v49 = vld [vmem:[#allocation2 + $0xd8] sm:$0xff]  ;;  %v54_v50 = vld [vmem:[#allocation2 + $0xe0] sm:$0xff]  ;;  %v105_v52 = vmax.f32 %v2162_v23, %v49_v42  ;;  %v2180_v53 = vmax.f32 %v43_v26, %v51_v43  ;;  %v2195_v4 = vmax.f32 %v94_v29, %v95_v30  ;;  %v2206_v11 = vmax.f32 %v95_v30, %v96_v31 }
  0x1a   :  { %v55_v51 = vld [vmem:[#allocation2 + $0xe8] sm:$0xff]  ;;  %v108_v54 = vmax.f32 %v44_v27, %v52_v44  ;;  %v56_v55 = vld [vmem:[#allocation2 + $0xf0] sm:$0xff]  ;;  %v57_v56 = vld [vmem:[#allocation2 + $0xf8] sm:$0xff]  ;;  %v109_v58 = vmax.f32 %v45_v28, %v53_v49  ;;  %v110_v59 = vmax.f32 %v46_v33, %v54_v50  ;;  %v152_v18 = vmax.f32 %v96_v31, %v97_v32 }
  0x1b   :  { %v2182_v57 = vld [vmem:[#allocation2 + $0x108] sm:$0xff]  ;;  %v111_v60 = vmax.f32 %v47_v34, %v55_v51  ;;  %v2186_v62 = vld [vmem:[#allocation2 + $0x110] sm:$0xff]  ;;  %v2188_v63 = vld [vmem:[#allocation2 + $0x118] sm:$0xff]  ;;  %v112_v1 = vmax.f32 %v48_v35, %v56_v55  ;;  %v113_v2 = vmax.f32 %v49_v42, %v57_v56  ;;  %v154_v19 = vmax.f32 %v2166_v36, %v100_v37 }
  0x1c   :  { %1963 = vperm.xlu1 %2064, %v1917_v15   ;;  %1958 = vperm.xlu0 %2063, %v1916_v16   ;;  %v2190_v0 = vld [vmem:[#allocation2 + $0x120] sm:$0xff]  ;;  %v2193_v3 = vmax.f32 %v51_v43, %v2182_v57  ;;  %v2197_v5 = vld [vmem:[#allocation2 + $0x128] sm:$0xff]  ;;  %v2199_v6 = vld [vmem:[#allocation2 + $0x130] sm:$0xff]  ;;  %v116_v8 = vmax.f32 %v52_v44, %v2186_v62  ;;  %v117_v9 = vmax.f32 %v53_v49, %v2188_v63  ;;  %v245_v15 = vrot.slane %v2169_v39, 1 }
  0x1d   :  { %3024 = vst [vmem:[#allocation8_spill] sm:$0xff] %v2190_v0  ;;  %3025 = vst [vmem:[#allocation9_spill] sm:$0xff] %v2197_v5  ;;  %v2201_v7 = vld [vmem:[#allocation2 + $0x138] sm:$0xff]  ;;  %v118_v10 = vmax.f32 %v54_v50, %v2190_v0  ;;  %v119_v12 = vmax.f32 %v55_v51, %v2197_v5  ;;  %v120_v13 = vmax.f32 %v56_v55, %v2199_v6  ;;  %v1921_v16 = vld [vmem:[%s2967_s1 + $0x2c] sm:$0xf]  ;;  %v246_v31 = vrot.slane %v2177_v48, 1 }
  0x1e   :  { %3026 = vst [vmem:[#allocation10_spill] sm:$0xff] %v2199_v6  ;;  %3027 = vst [vmem:[#allocation11_spill] sm:$0xff] %v2201_v7  ;;  %v121_v14 = vmax.f32 %v57_v56, %v2201_v7  ;;  %v1920_v17 = vld [vmem:[%s2967_s1 + $0x28] sm:$0xf]  ;;  %v155_v21 = vmax.f32 %v100_v37, %v101_v38  ;;  %v156_v22 = vmax.f32 %v101_v38, %v102_v45  ;;  %v1923_v32 = vld [vmem:[%s2967_s1 + $0x34] sm:$0xf] }
  0x1f   :  { %v157_v23 = vmax.f32 %v102_v45, %v103_v46  ;;  %v158_v24 = vmax.f32 %v103_v46, %v104_v47  ;;  %v159_v25 = vmax.f32 %v104_v47, %v105_v52  ;;  %v161_v26 = vmax.f32 %v2180_v53, %v108_v54  ;;  %v1922_v37 = vld [vmem:[%s2967_s1 + $0x30] sm:$0xf]  ;;  %v1925_v52 = vld [vmem:[%s2967_s1 + $0x3c] sm:$0xf] }
  0x20   :  { %1973 = vperm.xlu1 %2064, %v1919_v40   ;;  %1968 = vperm.xlu0 %2063, %v1918_v41   ;;  %v162_v27 = vmax.f32 %v108_v54, %v109_v58  ;;  %v163_v28 = vmax.f32 %v109_v58, %v110_v59  ;;  %v164_v29 = vmax.f32 %v110_v59, %v111_v60  ;;  %v247_v42 = vrot.slane %v2184_v61, 1  ;;  %v1924_v59 = vld [vmem:[%s2967_s1 + $0x38] sm:$0xf]  ;;  %s2113_s1 = smov [#allocation5]  }
  0x21   :  { %v165_v30 = vmax.f32 %v111_v60, %v112_v1  ;;  %v166_v33 = vmax.f32 %v112_v1, %v113_v2  ;;  %v168_v34 = vmax.f32 %v2193_v3, %v116_v8  ;;  %v169_v35 = vmax.f32 %v116_v8, %v117_v9  ;;  %s2044_s19 = sshll.u32 %s2113_s1, 4  ;;  %s2045_s19 = int_to_ptr.vmem [resolvable:$true] %s2044_s19 }
  0x22   :  { %v170_v38 = vmax.f32 %v117_v9, %v118_v10  ;;  %v171_v40 = vmax.f32 %v118_v10, %v119_v12  ;;  %v172_v41 = vmax.f32 %v119_v12, %v120_v13  ;;  %v173_v43 = vmax.f32 %v120_v13, %v121_v14  ;;  %s2085_s20 = scalar_lea.vmem %s2045_s19, 1024  ;;  %p2090_p6 = scmp.lt.s32.totalorder %s2045_s19, %s2045_s19 }
  0x23   :  { %v248_v44 = vrot.slane %v2195_v4, 1  ;;  %v249_v45 = vrot.slane %v2206_v11, 1  ;;  %v250_v46 = vrot.slane %v152_v18, 1  ;;  %v252_v47 = vrot.slane %v154_v19, 1  ;;  %p2086_p5 = scmp.ne.s32.totalorder %s2045_s19, %s2085_s20  ;;  %p2091_p7 = scmp.lt.s32.totalorder %s2085_s20, %s2085_s20 }
  0x24   :  { %1983 = vperm.xlu1 %2064, %v1921_v16   ;;  %1978 = vperm.xlu0 %2063, %v1920_v17   ;;  %v253_v49 = vrot.slane %v155_v21, 1  ;;  %v254_v50 = vrot.slane %v156_v22, 1  ;;  %v255_v51 = vrot.slane %v157_v23, 1  ;;  %v256_v54 = vrot.slane %v158_v24, 1 }
  0x25   :  { %v257_v55 = vrot.slane %v159_v25, 1  ;;  %v259_v56 = vrot.slane %v161_v26, 1  ;;  %v260_v58 = vrot.slane %v162_v27, 1  ;;  %v261_v60 = vrot.slane %v163_v28, 1  ;;  %p2092_p8 = por %p2091_p7, %p2090_p6 }
  0x26   :  { %v262_v1 = vrot.slane %v164_v29, 1  ;;  %v263_v2 = vrot.slane %v165_v30, 1  ;;  %v264_v8 = vrot.slane %v166_v33, 1  ;;  %v266_v9 = vrot.slane %v168_v34, 1 }
  0x27   :  { %v267_v10 = vrot.slane %v169_v35, 1  ;;  %v268_v12 = vrot.slane %v170_v38, 1  ;;  %v269_v13 = vrot.slane %v171_v40, 1  ;;  %v270_v14 = vrot.slane %v172_v41, 1  ;;  %p2093_p9 = pnand %p2092_p8, %p2086_p5 }
  0x28   :  { %1993 = vperm.xlu1 %2064, %v1923_v32   ;;  %1988 = vperm.xlu0 %2063, %v1922_v37   ;;  %v2238_v16 = vmax.f32 %v2169_v39, %v245_v15  ;;  %v2241_v17 = vmax.f32 %v2177_v48, %v246_v31  ;;  %v2244_v32 = vmax.f32 %v2184_v61, %v247_v42  ;;  %v271_v37 = vrot.slane %v173_v43, 1 }
  0x29   :  { %v2247_v7 = vmax.f32 %v2195_v4, %v248_v44  ;;  %v2250_v6 = vmax.f32 %v2206_v11, %v249_v45  ;;  %v2252_v5 = vmax.f32 %v152_v18, %v250_v46  ;;  %v350_v0 = vmax.f32 %v154_v19, %v252_v47  ;;  %v50_v45 = vld [vmem:[#allocation2 + $0xc0] sm:$0xff] }
  0x2a   :  { %v2254_v39 = vmax.f32 %v155_v21, %v253_v49  ;;  %v2256_v15 = vmax.f32 %v156_v22, %v254_v50  ;;  %v2258_v48 = vmax.f32 %v157_v23, %v255_v51  ;;  %v2260_v61 = vmax.f32 %v158_v24, %v256_v54  ;;  %v26_v21 = vld [vmem:[#allocation2] sm:$0xff] }
  0x2b   :  { %3028 = vst [vmem:[#allocation12_spill] sm:$0xff] %v2252_v5  ;;  %v355_v31 = vmax.f32 %v159_v25, %v257_v55  ;;  %v2262_v42 = vmax.f32 %v161_v26, %v259_v56  ;;  %v2266_v4 = vmax.f32 %v163_v28, %v261_v60  ;;  %v2268_v11 = vmax.f32 %v164_v29, %v262_v1  ;;  %v34_v22 = vld [vmem:[#allocation2 + $0x40] sm:$0xff]  ;;  %v2313_v55 = vld [vmem:[#allocation2 + $0x148] sm:$0xff] }
  0x2c   :  { %2003 = vperm.xlu1 %2064, %v1925_v52   ;;  %1998 = vperm.xlu0 %2063, %v1924_v59   ;;  %3029 = vst [vmem:[#allocation13_spill] sm:$0xff] %v2254_v39  ;;  %3030 = vst [vmem:[#allocation14_spill] sm:$0xff] %v2256_v15  ;;  %v2264_v52 = vmax.f32 %v162_v27, %v260_v58  ;;  %v2270_v18 = vmax.f32 %v165_v30, %v263_v2  ;;  %v42_v26 = vld [vmem:[#allocation2 + $0x80] sm:$0xff]  ;;  %v392_v29 = vmul.f32 2.4738085e-06, %v350_v0 }
  0x2d   :  { %3031 = vst [vmem:[#allocation15_spill] sm:$0xff] %v2258_v48  ;;  %3032 = vst [vmem:[#allocation16_spill] sm:$0xff] %v2260_v61  ;;  %v2272_v19 = vmax.f32 %v166_v33, %v264_v8  ;;  %v2274_v44 = vmax.f32 %v168_v34, %v266_v9  ;;  %v2276_v23 = vmax.f32 %v169_v35, %v267_v10  ;;  %v397_v30 = vmul.f32 2.4738085e-06, %v355_v31  ;;  %v58_v33 = vld [vmem:[#allocation2 + $0x100] sm:$0xff] }
  0x2e   :  { %3033 = vst [vmem:[#allocation17_spill] sm:$0xff] %v2262_v42  ;;  %3034 = vst [vmem:[#allocation18_spill] sm:$0xff] %v2264_v52  ;;  %v2278_v24 = vmax.f32 %v170_v38, %v268_v12  ;;  %v2280_v25 = vmax.f32 %v171_v40, %v269_v13  ;;  %v2282_v27 = vmax.f32 %v172_v41, %v270_v14  ;;  %v2304_v47 = vld [vmem:[#allocation2 + $0x140] sm:$0xff]  ;;  %v413_v50 = vmul.f32 0.0025662559, %v2262_v42 }
  0x2f   :  { %3035 = vst [vmem:[#allocation19_spill] sm:$0xff] %v2266_v4  ;;  %3036 = vst [vmem:[#allocation20_spill] sm:$0xff] %v2268_v11  ;;  %v2284_v28 = vmax.f32 %v173_v43, %v271_v37  ;;  %v2287_v46 = vmul.f32 2.4738085e-06, %v2274_v44  ;;  %v2290_v34 = vmul.f32 2.4738085e-06, %v2276_v23  ;;  %v90_v38 = vmax.f32 %v26_v21, %v34_v22 }
  0x30   :  { %3037 = vst [vmem:[#allocation21_spill] sm:$0xff] %v2270_v18  ;;  %3038 = vst [vmem:[#allocation22_spill] sm:$0xff] %v2272_v19  ;;  %v2293_v35 = vmul.f32 2.4738085e-06, %v2278_v24  ;;  %v2296_v40 = vmul.f32 2.4738085e-06, %v2280_v25  ;;  %v98_v49 = vmax.f32 %v34_v22, %v42_v26  ;;  %v106_v56 = vmax.f32 %v42_v26, %v50_v45 }
  0x31   :  { %3039 = vst [vmem:[#allocation23_spill] sm:$0xff] %v2274_v44  ;;  %3040 = vst [vmem:[#allocation24_spill] sm:$0xff] %v2276_v23  ;;  %v2299_v41 = vmul.f32 2.4738085e-06, %v2282_v27  ;;  %v2302_v43 = vmul.f32 2.4738085e-06, %v2284_v28  ;;  %v114_v1 = vmax.f32 %v50_v45, %v58_v33  ;;  %v2322_v2 = vadd.f32 %v413_v50, %v392_v29 }
  0x32   :  { %3041 = vst [vmem:[#allocation25_spill] sm:$0xff] %v2278_v24  ;;  %3042 = vst [vmem:[#allocation26_spill] sm:$0xff] %v2280_v25  ;;  %v2308_v51 = vmul.f32 0.0025662559, %v2264_v52  ;;  %v2311_v54 = vmul.f32 0.0025662559, %v2266_v4  ;;  %v122_v26 = vmax.f32 %v58_v33, %v2304_v47 }
  0x33   :  { %3043 = vst [vmem:[#allocation27_spill] sm:$0xff] %v2282_v27  ;;  %3044 = vst [vmem:[#allocation28_spill] sm:$0xff] %v2284_v28  ;;  %v2316_v58 = vmul.f32 0.0025662559, %v2268_v11  ;;  %v2319_v59 = vmul.f32 0.0025662559, %v2270_v18 }
  0x34   :  { %3045 = vst [vmem:[#allocation29_spill] sm:$0xff] %v2287_v46  ;;  %3046 = vst [vmem:[#allocation30_spill] sm:$0xff] %v2290_v34  ;;  %v418_v60 = vmul.f32 0.0025662559, %v2272_v19  ;;  %v2324_v8 = vmul.f32 0.16552375, %v350_v0  ;;  %v153_v19 = vmax.f32 %v98_v49, %v2166_v36 }
  0x35   :  { %3047 = vst [vmem:[#allocation31_spill] sm:$0xff] %v2293_v35  ;;  %3048 = vst [vmem:[#allocation32_spill] sm:$0xff] %v2296_v40  ;;  %v2327_v9 = vmul.f32 0.16552375, %v2254_v39  ;;  %v2330_v10 = vmul.f32 0.16552375, %v2256_v15 }
  0x36   :  { %3049 = vst [vmem:[#allocation33_spill] sm:$0xff] %v2299_v41  ;;  %3050 = vst [vmem:[#allocation34_spill] sm:$0xff] %v2302_v43  ;;  %v2332_v12 = vadd.f32 %v418_v60, %v397_v30  ;;  %v2335_v13 = vmul.f32 0.16552375, %v2258_v48  ;;  %v2338_v14 = vmul.f32 0.16552375, %v2260_v61  ;;  %v146_v48 = vmax.f32 %v90_v38, %v2160_v20 }
  0x37   :  { %3051 = vst [vmem:[#allocation35_spill] sm:$0xff] %v2308_v51  ;;  %3052 = vst [vmem:[#allocation36_spill] sm:$0xff] %v2311_v54  ;;  %v2340_v37 = vmul.f32 0.16552375, %v355_v31  ;;  %v490_v21 = vmul.f32 0.663815, %v2238_v16  ;;  %v167_v38 = vmax.f32 %v114_v1, %v2193_v3 }
  0x38   :  { %3053 = vst [vmem:[#allocation37_spill] sm:$0xff] %v2316_v58  ;;  %3054 = vst [vmem:[#allocation38_spill] sm:$0xff] %v2319_v59  ;;  %v491_v0 = vmul.f32 0.663815, %v2241_v17  ;;  %v492_v22 = vmul.f32 0.663815, %v2244_v32 }
  0x39   :  { %3055 = vst [vmem:[#allocation39_spill] sm:$0xff] %v2322_v2  ;;  %3056 = vst [vmem:[#allocation40_spill] sm:$0xff] %v2324_v8  ;;  %v493_v29 = vmul.f32 0.663815, %v2247_v7  ;;  %v494_v30 = vmul.f32 0.663815, %v2250_v6  ;;  %v546_v31 = vadd.f32 %v490_v21, %v2324_v8  ;;  %v160_v21 = vmax.f32 %v106_v56, %v2180_v53 }
  0x3a   :  { %3057 = vst [vmem:[#allocation41_spill] sm:$0xff] %v2327_v9  ;;  %3058 = vst [vmem:[#allocation42_spill] sm:$0xff] %v2330_v10  ;;  %v495_v45 = vmul.f32 0.663815, %v2252_v5  ;;  %v547_v2 = vadd.f32 %v491_v0, %v2327_v9  ;;  %v548_v61 = vadd.f32 %v492_v22, %v2330_v10 }
  0x3b   :  { %3059 = vst [vmem:[#allocation43_spill] sm:$0xff] %v2332_v12  ;;  %3060 = vst [vmem:[#allocation44_spill] sm:$0xff] %v2335_v13  ;;  %v2351_v12 = vmax.f32 %v2182_v57, %v2313_v55  ;;  %v549_v33 = vadd.f32 %v493_v29, %v2335_v13  ;;  %v550_v15 = vadd.f32 %v494_v30, %v2338_v14  ;;  %v2367_v29 = vld [vmem:[#allocation2 + $0x150] sm:$0xff] }
  0x3c   :  { %3061 = vst [vmem:[#allocation45_spill] sm:$0xff] %v2338_v14  ;;  %3062 = vst [vmem:[#allocation46_spill] sm:$0xff] %v2340_v37  ;;  %v551_v39 = vadd.f32 %v495_v45, %v2340_v37  ;;  %v581_v28 = vadd.f32 %v546_v31, %v413_v50  ;;  %v582_v57 = vadd.f32 %v547_v2, %v2308_v51 }
  0x3d   :  { %v583_v5 = vadd.f32 %v548_v61, %v2311_v54  ;;  %v584_v0 = vadd.f32 %v549_v33, %v2316_v58  ;;  %v585_v22 = vadd.f32 %v550_v15, %v2319_v59  ;;  %v174_v50 = vmax.f32 %v122_v26, %v2351_v12 }
  0x3e   :  { %v586_v20 = vadd.f32 %v551_v39, %v418_v60  ;;  %v616_v30 = vadd.f32 %v581_v28, %v2287_v46  ;;  %v617_v36 = vadd.f32 %v582_v57, %v2290_v34  ;;  %v244_v15 = vrot.slane %v146_v48, 1  ;;  %v2376_v39 = vld [vmem:[#allocation2 + $0x158] sm:$0xff] }
  0x3f   :  { %v618_v49 = vadd.f32 %v583_v5, %v2293_v35  ;;  %v619_v61 = vadd.f32 %v584_v0, %v2296_v40  ;;  %v620_v53 = vadd.f32 %v585_v22, %v2299_v41  ;;  %v2384_v28 = vmax.f32 %v2186_v62, %v2367_v29 }
  0x40   :  { %v621_v56 = vadd.f32 %v586_v20, %v2302_v43  ;;  %v643_v3 = vmul.f32 2.4738085e-06, %v616_v30  ;;  %v2378_v60 = vmul.f32 0.0025662559, %v617_v36  ;;  %v342_v45 = vmax.f32 %v146_v48, %v244_v15 }
  0x41   :  { %v2380_v1 = vmul.f32 0.16552375, %v618_v49  ;;  %v677_v5 = vmul.f32 0.16552375, %v620_v53  ;;  %v701_v2 = vmul.f32 0.663815, %v619_v61  ;;  %v2389_v41 = vmax.f32 %v2188_v63, %v2376_v39 }
  0x42   :  { %v747_v26 = vmul.f32 0.0025662559, %v621_v56  ;;  %v664_v31 = vadd.f32 %v2378_v60, %v643_v3  ;;  %v251_v33 = vrot.slane %v153_v19, 1  ;;  %v258_v57 = vrot.slane %v160_v21, 1 }
  0x43   :  { %v265_v0 = vrot.slane %v167_v38, 1  ;;  %v272_v22 = vrot.slane %v174_v50, 1  ;;  %v405_v20 = vmul.f32 0.0025662559, %v342_v45  ;;  %v489_v43 = vmul.f32 0.663815, %v342_v45 }
  0x44   :  { %v688_v62 = vadd.f32 %v2380_v1, %v664_v31  ;;  %v349_v40 = vmax.f32 %v153_v19, %v251_v33  ;;  %v356_v35 = vmax.f32 %v160_v21, %v258_v57  ;;  %v2394_v15 = vmul.f32 2.4738085e-06, %v618_v49 }
  0x45   :  { %v363_v34 = vmax.f32 %v167_v38, %v265_v0  ;;  %v2392_v48 = vmax.f32 %v174_v50, %v272_v22  ;;  %v2396_v3 = vmul.f32 0.16552375, %v616_v30  ;;  %v2398_v46 = vmul.f32 0.0025662559, %v619_v61  ;;  %v70_v50 = vld [vmem:[#allocation2 + $0x160] sm:$0xff]  ;;  %v71_v61 = vld [vmem:[#allocation2 + $0x168] sm:$0xff] }
  0x46   :  { %v717_v59 = vadd.f32 %v701_v2, %v688_v62  ;;  %v391_v58 = vmul.f32 2.4738085e-06, %v349_v40  ;;  %v412_v54 = vmul.f32 0.0025662559, %v356_v35  ;;  %v447_v51 = vmul.f32 0.16552375, %v349_v40 }
  0x47   :  { %3063 = vst [vmem:[#allocation47_spill] sm:$0xff] %v2392_v48  ;;  %v398_v45 = vmul.f32 2.4738085e-06, %v363_v34  ;;  %v2401_v63 = vmul.f32 0.0025662559, %v2392_v48  ;;  %v665_v19 = vadd.f32 %v2398_v46, %v2394_v15  ;;  %v72_v40 = vld [vmem:[#allocation2 + $0x170] sm:$0xff] }
  0x48   :  { %v2403_v31 = vmul.f32 0.16552375, %v363_v34  ;;  %v733_v21 = vadd.f32 %v717_v59, %v677_v5  ;;  %v433_v38 = vadd.f32 %v412_v54, %v391_v58  ;;  %v2407_v49 = vmul.f32 0.663815, %v356_v35  ;;  %v2414_v34 = vld [vmem:[#allocation2 + $0x180] sm:$0xff]  ;;  %v2416_v22 = vld [vmem:[#allocation2 + $0x188] sm:$0xff] }
  0x49   :  { %3064 = vst [vmem:[#allocation48_spill] sm:$0xff] %v2401_v63  ;;  %v702_v30 = vmul.f32 0.663815, %v621_v56  ;;  %v2410_v2 = vadd.f32 %v2401_v63, %v398_v45  ;;  %v2412_v33 = vadd.f32 %v447_v51, %v405_v20  ;;  %v545_v57 = vadd.f32 %v489_v43, %v447_v51  ;;  %3067 = vst [vmem:[#allocation51_spill] sm:$0xff] %v2416_v22  ;;  %v2425_v56 = vld [vmem:[#allocation2 + $0x190] sm:$0xff]  ;;  %v2429_v51 = vld [vmem:[#allocation2 + $0x1a0] sm:$0xff] }
  0x4a   :  { %3065 = vst [vmem:[#allocation49_spill] sm:$0xff] %v2403_v31  ;;  %v689_v0 = vadd.f32 %v677_v5, %v665_v19  ;;  %v753_v62 = vadd.f32 %v747_v26, %v733_v21  ;;  %v2419_v58 = vadd.f32 %v2403_v31, %v433_v38  ;;  %v2421_v35 = vmul.f32 0.663815, %v617_v36  ;;  %3069 = vst [vmem:[#allocation53_spill] sm:$0xff] %v2425_v56  ;;  %v2431_v5 = vld [vmem:[#allocation2 + $0x1a8] sm:$0xff]  ;;  %v3073_v19 = vld [vmem:[#allocation8_spill] sm:$0xff] }
  0x4b   :  { %3066 = vst [vmem:[#allocation50_spill] sm:$0xff] %v2410_v2  ;;  %v2423_v59 = vmul.f32 2.4738085e-06, %v620_v53  ;;  %v2427_v2 = vld [vmem:[#allocation2 + $0x198] sm:$0xff]  ;;  %v580_v20 = vadd.f32 %v545_v57, %v412_v54  ;;  %3071 = vst [vmem:[#allocation55_spill] sm:$0xff] %v2429_v51  ;;  %v2434_v48 = vmax.f32 %v3073_v19, %v70_v50  ;;  %v3074_v26 = vld [vmem:[#allocation9_spill] sm:$0xff]  ;;  %v2452_v19 = vmax.f32 %v2367_v29, %v2425_v56 }
  0x4c   :  { %3068 = vst [vmem:[#allocation52_spill] sm:$0xff] %v2419_v58  ;;  %3070 = vst [vmem:[#allocation54_spill] sm:$0xff] %v2427_v2  ;;  %v718_v43 = vadd.f32 %v702_v30, %v689_v0  ;;  %v2437_v21 = vmax.f32 %v3074_v26, %v71_v61  ;;  %v805_v36 = vrot.slane %v753_v62, 5  ;;  %v2439_v38 = vld [vmem:[#allocation2 + $0x1b0] sm:$0xff]  ;;  %v2448_v30 = vmax.f32 %v2313_v55, %v2416_v22 }
  0x4d   :  { %3072 = vst [vmem:[#allocation56_spill] sm:$0xff] %v2431_v5  ;;  %3075 = vst [vmem:[#allocation8_spill] sm:$0xff] %v2439_v38  ;;  %v3076_v53 = vld [vmem:[#allocation10_spill] sm:$0xff]  ;;  %v615_v57 = vadd.f32 %v580_v20, %v398_v45  ;;  %v2456_v62 = vmax.f32 %v2376_v39, %v2427_v2  ;;  %v2461_v54 = vmax.f32 %v70_v50, %v2429_v51 }
  0x4e   :  { %v2442_v58 = vmax.f32 %v3076_v53, %v72_v40  ;;  %v806_v0 = vrot.slane %v718_v43, 5  ;;  %v838_v26 = vsel %vm835_vm0, 0.0, %v805_v36  ;;  %v855_v53 = vsel %vm852_vm1, %v805_v36, 0.0 }
  0x4f   :  { %v2464_v55 = vmax.f32 %v71_v61, %v2431_v5  ;;  %v871_v45 = vmul.f32 2.4738085e-06, %v838_v26  ;;  %v887_v20 = vmul.f32 0.0025662559, %v838_v26  ;;  %v967_v43 = vmul.f32 0.16552375, %v838_v26 }
  0x50   :  { %v2467_v29 = vmax.f32 %v72_v40, %v2439_v38  ;;  %v1047_v56 = vmul.f32 0.663815, %v838_v26  ;;  %v1287_v22 = vmul.f32 2.4738085e-06, %v855_v53  ;;  %v1367_v39 = vmul.f32 0.16552375, %v855_v53 }
  0x51   :  { %v2471_v2 = vmax.f32 %v2351_v12, %v2384_v28  ;;  %v919_v36 = vrot.slane %v887_v20, 1  ;;  %v999_v37 = vrot.slane %v967_v43, 2  ;;  %v1127_v50 = vrot.slane %v967_v43, 4 }
  0x52   :  { %v1175_v51 = vrot.slane %v887_v20, 5  ;;  %v1079_v63 = vrot.slane %v1047_v56, 3  ;;  %v1239_v61 = vrot.slane %v871_v45, 6  ;;  %v1319_v5 = vrot.slane %v1287_v22, 6 }
  0x53   :  { %v1399_v31 = vrot.slane %v1367_v39, 4  ;;  %v951_v18 = vadd.f32 %v919_v36, %v871_v45  ;;  %v1447_v11 = vmul.f32 0.0025662559, %v855_v53  ;;  %v1543_v4 = vrot.slane %v1367_v39, 2 }
  0x54   :  { %v1591_v40 = vmul.f32 0.663815, %v855_v53  ;;  %v699_v38 = vmul.f32 0.663815, %v615_v57  ;;  %v839_v26 = vsel %vm835_vm0, 0.0, %v806_v0  ;;  %v2475_v52 = vsel %vm852_vm1, %v806_v0, 0.0 }
  0x55   :  { %v2477_v12 = vmul.f32 0.0025662559, %v615_v57  ;;  %v1031_v42 = vadd.f32 %v999_v37, %v951_v18  ;;  %v1479_v14 = vrot.slane %v1447_v11, 5  ;;  %v1575_v43 = vadd.f32 %v1543_v4, %v951_v18 }
  0x56   :  { %v1623_v20 = vrot.slane %v1591_v40, 3  ;;  %v731_v22 = vadd.f32 %v699_v38, %v2396_v3  ;;  %v2480_v56 = vmul.f32 2.4738085e-06, %v839_v26  ;;  %v888_v45 = vmul.f32 0.0025662559, %v839_v26 }
  0x57   :  { %v968_v39 = vmul.f32 0.16552375, %v839_v26  ;;  %v1111_v53 = vadd.f32 %v1079_v63, %v1031_v42  ;;  %v1048_v13 = vmul.f32 0.663815, %v839_v26  ;;  %v1288_v10 = vmul.f32 2.4738085e-06, %v2475_v52 }
  0x58   :  { %v1655_v36 = vadd.f32 %v1623_v20, %v1575_v43  ;;  %v751_v0 = vadd.f32 %v731_v22, %v2378_v60  ;;  %v920_v57 = vrot.slane %v888_v45, 1  ;;  %v1176_v24 = vrot.slane %v888_v45, 5 }
  0x59   :  { %v1000_v27 = vrot.slane %v968_v39, 2  ;;  %v1128_v37 = vrot.slane %v968_v39, 4  ;;  %v1159_v11 = vadd.f32 %v1127_v50, %v1111_v53  ;;  %v1431_v4 = vadd.f32 %v1399_v31, %v1111_v53 }
  0x5a   :  { %v1671_v18 = vadd.f32 %v1655_v36, %v1399_v31  ;;  %v1080_v40 = vrot.slane %v1048_v13, 3  ;;  %v771_v38 = vadd.f32 %v751_v0, %v2394_v15  ;;  %v952_v25 = vadd.f32 %v920_v57, %v2480_v56 }
  0x5b   :  { %v1240_v42 = vrot.slane %v2480_v56, 6  ;;  %v1207_v63 = vadd.f32 %v1175_v51, %v1159_v11  ;;  %v1511_v26 = vadd.f32 %v1479_v14, %v1431_v4  ;;  %v2487_v20 = vrot.slane %v1288_v10, 6 }
  0x5c   :  { %v1687_v43 = vadd.f32 %v1671_v18, %v1479_v14  ;;  %v803_v60 = vrot.slane %v771_v38, 5  ;;  %v1032_v22 = vadd.f32 %v1000_v27, %v952_v25  ;;  %v2490_v39 = vmul.f32 0.16552375, %v2475_v52 }
  0x5d   :  { %v2493_v31 = vmul.f32 0.0025662559, %v2475_v52  ;;  %v1271_v13 = vadd.f32 %v1239_v61, %v1207_v63  ;;  %v1351_v15 = vadd.f32 %v1319_v5, %v1207_v63  ;;  %v1527_v50 = vadd.f32 %v1511_v26, %v1319_v5 }
  0x5e   :  { %v1703_v53 = vadd.f32 %v1687_v43, %v1319_v5  ;;  %v836_v45 = vsel %vm835_vm0, 0.0, %v803_v60  ;;  %v853_v51 = vsel %vm852_vm1, %v803_v60, 0.0  ;;  %v1112_v56 = vadd.f32 %v1080_v40, %v1032_v22 }
  0x5f   :  { %v1735_v14 = vrot.slane %v1351_v15, 1  ;;  %v1783_v36 = vrot.slane %v1527_v50, 2  ;;  %v869_v0 = vmul.f32 2.4738085e-06, %v836_v45  ;;  %v885_v57 = vmul.f32 0.0025662559, %v836_v45 }
  0x60   :  { %v1831_v27 = vrot.slane %v1703_v53, 3  ;;  %v965_v11 = vmul.f32 0.16552375, %v836_v45  ;;  %v1045_v4 = vmul.f32 0.663815, %v836_v45  ;;  %v1160_v18 = vadd.f32 %v1128_v37, %v1112_v56 }
  0x61   :  { %v1864_v61 = vsel %vm1861_vm2, %v1271_v13, %v1735_v14  ;;  %v1237_v38 = vrot.slane %v869_v0, 6  ;;  %v1285_v63 = vmul.f32 2.4738085e-06, %v853_v51  ;;  %v1365_v5 = vmul.f32 0.16552375, %v853_v51 }
  0x62   :  { %v1880_v26 = vsel %vm852_vm1, %v1864_v61, %v1783_v36  ;;  %v917_v43 = vrot.slane %v885_v57, 1  ;;  %v997_v60 = vrot.slane %v965_v11, 2  ;;  %v1077_v40 = vrot.slane %v1045_v4, 3 }
  0x63   :  { %v2501_v22 = vsel %vm835_vm0, %v1880_v26, %v1831_v27  ;;  %v1125_v15 = vrot.slane %v965_v11, 4  ;;  %v1173_v50 = vrot.slane %v885_v57, 5  ;;  %v1317_v53 = vrot.slane %v1285_v63, 6 }
  0x64   :  { %v949_v10 = vadd.f32 %v917_v43, %v869_v0  ;;  %v1397_v23 = vrot.slane %v1365_v5, 4  ;;  %v1445_v45 = vmul.f32 0.0025662559, %v853_v51  ;;  %v1541_v37 = vrot.slane %v1365_v5, 2 }
  0x65   :  { %v1589_v9 = vmul.f32 0.663815, %v853_v51  ;;  %v1208_v13 = vadd.f32 %v1176_v24, %v1160_v18  ;;  %v3077_v14 = vrot.slane %v2490_v39, 4  ;;  %v1480_v36 = vrot.slane %v2493_v31, 5 }
  0x66   :  { %v1029_v61 = vadd.f32 %v997_v60, %v949_v10  ;;  %v1477_v8 = vrot.slane %v1445_v45, 5  ;;  %v1573_v4 = vadd.f32 %v1541_v37, %v949_v10  ;;  %v1544_v27 = vrot.slane %v2490_v39, 2 }
  0x67   :  { %v1432_v44 = vadd.f32 %v3077_v14, %v1112_v56  ;;  %v1621_v26 = vrot.slane %v1589_v9, 3  ;;  %v1272_v11 = vadd.f32 %v1240_v42, %v1208_v13  ;;  %v1352_v57 = vadd.f32 %v2487_v20, %v1208_v13 }
  0x68   :  { %v1109_v63 = vadd.f32 %v1077_v40, %v1029_v61  ;;  %v1576_v43 = vadd.f32 %v1544_v27, %v952_v25  ;;  %v1592_v51 = vmul.f32 0.663815, %v2475_v52  ;;  %v687_v24 = vadd.f32 %v2396_v3, %v2477_v12 }
  0x69   :  { %v1512_v0 = vadd.f32 %v1480_v36, %v1432_v44  ;;  %v1653_v56 = vadd.f32 %v1621_v26, %v1573_v4  ;;  %v1736_v18 = vrot.slane %v1352_v57, 1  ;;  %v2514_v10 = vmax.f32 %v2384_v28, %v2389_v41 }
  0x6a   :  { %v1157_v9 = vadd.f32 %v1125_v15, %v1109_v63  ;;  %v1429_v42 = vadd.f32 %v1397_v23, %v1109_v63  ;;  %v1624_v5 = vrot.slane %v1592_v51, 3  ;;  %v716_v44 = vadd.f32 %v2421_v35, %v687_v24 }
  0x6b   :  { %v1528_v31 = vadd.f32 %v1512_v0, %v2487_v20  ;;  %v1669_v60 = vadd.f32 %v1653_v56, %v1397_v23  ;;  %v1865_v52 = vsel %vm1861_vm2, %v1272_v11, %v1736_v18  ;;  %v2520_v3 = vmax.f32 %v2389_v41, %v2434_v48 }
  0x6c   :  { %v1205_v12 = vadd.f32 %v1173_v50, %v1157_v9  ;;  %v1509_v40 = vadd.f32 %v1477_v8, %v1429_v42  ;;  %v1656_v45 = vadd.f32 %v1624_v5, %v1576_v43  ;;  %v732_v37 = vadd.f32 %v716_v44, %v2380_v1 }
  0x6d   :  { %v1784_v25 = vrot.slane %v1528_v31, 2  ;;  %v1685_v28 = vadd.f32 %v1669_v60, %v1477_v8  ;;  %v2526_v13 = vmax.f32 %v2434_v48, %v2437_v21  ;;  %v2530_v23 = vmax.f32 %v2437_v21, %v2442_v58 }
  0x6e   :  { %v1269_v35 = vadd.f32 %v1237_v38, %v1205_v12  ;;  %v1349_v14 = vadd.f32 %v1317_v53, %v1205_v12  ;;  %v1525_v41 = vadd.f32 %v1509_v40, %v1317_v53  ;;  %v3078_v50 = vrot.slane %v2490_v39, 4 }
  0x6f   :  { %v1881_v15 = vsel %vm852_vm1, %v1865_v52, %v1784_v25  ;;  %v1701_v4 = vadd.f32 %v1685_v28, %v1317_v53  ;;  %v752_v1 = vadd.f32 %v732_v37, %v2398_v46  ;;  %v3079_v8 = vmax.f32 %v2304_v47, %v2414_v34 }
  0x70   :  { %v1672_v61 = vadd.f32 %v1656_v45, %v3078_v50  ;;  %v182_v48 = vmax.f32 %v2448_v30, %v2452_v19  ;;  %v1733_v26 = vrot.slane %v1349_v14, 1  ;;  %v1781_v21 = vrot.slane %v1525_v41, 2 }
  0x71   :  { %v181_v27 = vmax.f32 %v3079_v8, %v2448_v30  ;;  %v183_v38 = vmax.f32 %v2452_v19, %v2456_v62  ;;  %v1829_v57 = vrot.slane %v1701_v4, 3  ;;  %v772_v39 = vadd.f32 %v2423_v59, %v752_v1 }
  0x72   :  { %v1688_v11 = vadd.f32 %v1672_v61, %v1480_v36  ;;  %v184_v46 = vmax.f32 %v2456_v62, %v2461_v54  ;;  %v185_v53 = vmax.f32 %v2461_v54, %v2464_v55  ;;  %v1862_v47 = vsel %vm1861_vm2, %v1269_v35, %v1733_v26 }
  0x73   :  { %v186_v30 = vmax.f32 %v2464_v55, %v2467_v29  ;;  %v273_v36 = vrot.slane %v2471_v2, 1  ;;  %v1878_v19 = vsel %vm852_vm1, %v1862_v47, %v1781_v21  ;;  %v804_v63 = vrot.slane %v772_v39, 5 }
  0x74   :  { %v1704_v0 = vadd.f32 %v1688_v11, %v2487_v20  ;;  %v274_v59 = vrot.slane %v2514_v10, 1  ;;  %v275_v43 = vrot.slane %v2520_v3, 1  ;;  %v2557_v62 = vsel %vm835_vm0, %v1878_v19, %v1829_v57 }
  0x75   :  { %v276_v51 = vrot.slane %v2526_v13, 1  ;;  %v277_v20 = vrot.slane %v2530_v23, 1  ;;  %v837_v24 = vsel %vm835_vm0, 0.0, %v804_v63  ;;  %v854_v55 = vsel %vm852_vm1, %v804_v63, 0.0 }
  0x76   :  { %v1832_v54 = vrot.slane %v1704_v0, 3  ;;  %v279_v56 = vrot.slane %v181_v27, 1  ;;  %v280_v31 = vrot.slane %v182_v48, 1  ;;  %v870_v9 = vmul.f32 2.4738085e-06, %v837_v24 }
  0x77   :  { %v886_v42 = vmul.f32 0.0025662559, %v837_v24  ;;  %v966_v5 = vmul.f32 0.16552375, %v837_v24  ;;  %v1046_v44 = vmul.f32 0.663815, %v837_v24  ;;  %v2567_v52 = vmax.f32 %v2471_v2, %v273_v36 }
  0x78   :  { %v2564_v18 = vsel %vm835_vm0, %v1881_v15, %v1832_v54  ;;  %v1286_v60 = vmul.f32 2.4738085e-06, %v854_v55  ;;  %v1366_v25 = vmul.f32 0.16552375, %v854_v55  ;;  %v1238_v35 = vrot.slane %v870_v9, 6 }
  0x79   :  { %v918_v12 = vrot.slane %v886_v42, 1  ;;  %v998_v40 = vrot.slane %v966_v5, 2  ;;  %v1126_v45 = vrot.slane %v966_v5, 4  ;;  %v1174_v37 = vrot.slane %v886_v42, 5 }
  0x7a   :  { %v1078_v28 = vrot.slane %v1046_v44, 3  ;;  %v1318_v14 = vrot.slane %v1286_v60, 6  ;;  %v1398_v41 = vrot.slane %v1366_v25, 4  ;;  %v1446_v15 = vmul.f32 0.0025662559, %v854_v55  ;;  %v3086_v60 = vld [vmem:[#allocation23_spill] sm:$0xff] }
  0x7b   :  { %v950_v50 = vadd.f32 %v918_v12, %v870_v9  ;;  %v1542_v61 = vrot.slane %v1366_v25, 2  ;;  %v1590_v4 = vmul.f32 0.663815, %v854_v55  ;;  %v281_v1 = vrot.slane %v183_v38, 1  ;;  %v3087_v12 = vld [vmem:[#allocation41_spill] sm:$0xff] }
  0x7c   :  { %v282_v8 = vrot.slane %v184_v46, 1  ;;  %v283_v26 = vrot.slane %v185_v53, 1  ;;  %v284_v21 = vrot.slane %v186_v30, 1  ;;  %v1478_v57 = vrot.slane %v1446_v15, 5 }
  0x7d   :  { %v1030_v11 = vadd.f32 %v998_v40, %v950_v50  ;;  %v1574_v2 = vadd.f32 %v1542_v61, %v950_v50  ;;  %v1622_v39 = vrot.slane %v1590_v4, 3  ;;  %v2570_v47 = vmax.f32 %v2514_v10, %v274_v59  ;;  %v3091_v4 = vld [vmem:[#allocation27_spill] sm:$0xff] }
  0x7e   :  { %v2573_v0 = vmax.f32 %v2520_v3, %v275_v43  ;;  %v2576_v36 = vmax.f32 %v2526_v13, %v276_v51  ;;  %v2579_v19 = vmax.f32 %v2530_v23, %v277_v20  ;;  %v2581_v24 = vmax.f32 %v181_v27, %v279_v56 }
  0x7f   :  { %v1110_v63 = vadd.f32 %v1078_v28, %v1030_v11  ;;  %v1654_v54 = vadd.f32 %v1622_v39, %v1574_v2  ;;  %v2583_v55 = vmax.f32 %v182_v48, %v280_v31  ;;  %v2585_v9 = vmax.f32 %v183_v38, %v281_v1  ;;  %v3093_v11 = vld [vmem:[#allocation44_spill] sm:$0xff]  ;;  %v3094_v2 = vld [vmem:[#allocation45_spill] sm:$0xff] }
  0x80   :  { %v2587_v42 = vmax.f32 %v184_v46, %v282_v8  ;;  %v2589_v10 = vmax.f32 %v185_v53, %v283_v26  ;;  %v2591_v3 = vmax.f32 %v186_v30, %v284_v21  ;;  %v406_v23 = vmul.f32 0.0025662559, %v2238_v16  ;;  %v3092_v8 = vld [vmem:[#allocation42_spill] sm:$0xff] }
  0x81   :  { %v1158_v59 = vadd.f32 %v1126_v45, %v1110_v63  ;;  %v1430_v13 = vadd.f32 %v1398_v41, %v1110_v63  ;;  %v1670_v43 = vadd.f32 %v1654_v54, %v1398_v41  ;;  %v407_v51 = vmul.f32 0.0025662559, %v2241_v17  ;;  %v3088_v41 = vld [vmem:[#allocation24_spill] sm:$0xff]  ;;  %v3095_v63 = vld [vmem:[#allocation17_spill] sm:$0xff] }
  0x82   :  { %v408_v27 = vmul.f32 0.0025662559, %v2244_v32  ;;  %v409_v48 = vmul.f32 0.0025662559, %v2247_v7  ;;  %v524_v38 = vadd.f32 %v2407_v49, %v2412_v33  ;;  %v410_v30 = vmul.f32 0.0025662559, %v2250_v6 }
  0x83   :  { %v1206_v46 = vadd.f32 %v1174_v37, %v1158_v59  ;;  %v1510_v20 = vadd.f32 %v1478_v57, %v1430_v13  ;;  %v1686_v53 = vadd.f32 %v1670_v43, %v1478_v57  ;;  %v2601_v56 = vmul.f32 0.0025662559, %v2567_v52  ;;  %v3083_v32 = vld [vmem:[#allocation40_spill] sm:$0xff]  ;;  %v3096_v13 = vld [vmem:[#allocation18_spill] sm:$0xff] }
  0x84   :  { %v2604_v16 = vmul.f32 0.0025662559, %v2570_v47  ;;  %v2607_v17 = vmul.f32 0.0025662559, %v2573_v0  ;;  %v469_v7 = vadd.f32 %v3083_v32, %v406_v23  ;;  %v2611_v44 = vmul.f32 0.0025662559, %v2576_v36 }
  0x85   :  { %3080 = vst [vmem:[#allocation9_spill] sm:$0xff] %v2601_v56  ;;  %v1270_v31 = vadd.f32 %v1238_v35, %v1206_v46  ;;  %v1350_v5 = vadd.f32 %v1318_v14, %v1206_v46  ;;  %v1526_v49 = vadd.f32 %v1510_v20, %v1318_v14  ;;  %v1702_v33 = vadd.f32 %v1686_v53, %v1318_v14  ;;  %v3089_v35 = vld [vmem:[#allocation25_spill] sm:$0xff]  ;;  %v3090_v14 = vld [vmem:[#allocation26_spill] sm:$0xff]  ;;  %v3097_v23 = vld [vmem:[#allocation19_spill] sm:$0xff] }
  0x86   :  { %3081 = vst [vmem:[#allocation10_spill] sm:$0xff] %v2604_v16  ;;  %3082 = vst [vmem:[#allocation57_spill] sm:$0xff] %v2607_v17  ;;  %v2614_v6 = vmul.f32 0.0025662559, %v2579_v19  ;;  %v2617_v25 = vmul.f32 0.16552375, %v3086_v60  ;;  %v470_v40 = vadd.f32 %v3087_v12, %v407_v51  ;;  %v471_v26 = vadd.f32 %v3092_v8, %v408_v27 }
  0x87   :  { %3084 = vst [vmem:[#allocation40_spill] sm:$0xff] %v2611_v44  ;;  %v1734_v45 = vrot.slane %v1350_v5, 1  ;;  %v1782_v37 = vrot.slane %v1526_v49, 2  ;;  %v1830_v28 = vrot.slane %v1702_v33, 3  ;;  %v2621_v50 = vmul.f32 0.16552375, %v3088_v41 }
  0x88   :  { %3085 = vst [vmem:[#allocation58_spill] sm:$0xff] %v2614_v6  ;;  %v2624_v15 = vmul.f32 0.16552375, %v3089_v35  ;;  %v2627_v61 = vmul.f32 0.16552375, %v3090_v14  ;;  %v472_v57 = vadd.f32 %v3093_v11, %v409_v48  ;;  %v473_v39 = vadd.f32 %v3094_v2, %v410_v30  ;;  %v3098_v46 = vld [vmem:[#allocation20_spill] sm:$0xff] }
  0x89   :  { %v2630_v1 = vmul.f32 0.16552375, %v3091_v4  ;;  %v1863_v21 = vsel %vm1861_vm2, %v1270_v31, %v1734_v45  ;;  %v497_v54 = vmul.f32 0.663815, %v3095_v63  ;;  %v498_v43 = vmul.f32 0.663815, %v3096_v13 }
  0x8a   :  { %v1879_v59 = vsel %vm852_vm1, %v1863_v21, %v1782_v37  ;;  %v499_v51 = vmul.f32 0.663815, %v3097_v23  ;;  %v500_v20 = vmul.f32 0.663815, %v3098_v46  ;;  %v3099_v32 = vld [vmem:[#allocation21_spill] sm:$0xff]  ;;  %v3101_v4 = vld [vmem:[#allocation48_spill] sm:$0xff] }
  0x8b   :  { %v1895_v53 = vsel %vm835_vm0, %v1879_v59, %v1830_v28  ;;  %v501_v27 = vmul.f32 0.663815, %v3099_v32  ;;  %v525_v5 = vadd.f32 %v497_v54, %v469_v7  ;;  %v3100_v31 = vld [vmem:[#allocation49_spill] sm:$0xff]  ;;  %v1939_v48 = vpop.permute.xlu1 %1938  ;;  %v1929_v33 = vpop.permute.xlu0 %1928  ;;  %v526_v30 = vadd.f32 %v498_v43, %v470_v40  ;;  %v73_v54 = vld [vmem:[#allocation2 + $0x178] sm:$0xff] }
  0x8c   :  { %v552_v49 = vadd.f32 %v524_v38, %v3100_v31  ;;  %v527_v60 = vadd.f32 %v499_v51, %v471_v26  ;;  %v528_v12 = vadd.f32 %v500_v20, %v472_v57  ;;  %v608_v45 = vmul.f32 2.4738085e-06, %v2581_v24  ;;  %v2662_v59 = vld [vmem:[#allocation2 + $0x1b8] sm:$0xff] }
  0x8d   :  { %v2008_v37 = vmul.f32 %v1939_v48, %v2501_v22  ;;  %v2006_v41 = vmul.f32 %v1929_v33, %v2557_v62  ;;  %v529_v35 = vadd.f32 %v501_v27, %v473_v39  ;;  %v553_v14 = vadd.f32 %v525_v5, %v2617_v25 }
  0x8e   :  { %v554_v28 = vadd.f32 %v526_v30, %v2621_v50  ;;  %v555_v7 = vadd.f32 %v527_v60, %v2624_v15  ;;  %v556_v38 = vadd.f32 %v528_v12, %v2627_v61  ;;  %v587_v8 = vadd.f32 %v552_v49, %v3101_v4  ;;  %v3102_v49 = vld [vmem:[#allocation11_spill] sm:$0xff] }
  0x8f   :  { %2025 = vst.msk [vmem:[#allocation5 + $0x8] sm:$0xf] %vm2022_vm3, %v2008_v37  ;;  %2023 = vst.msk [vmem:[#allocation5] sm:$0xf] %vm2022_vm3, %v2006_v41  ;;  %v557_v40 = vadd.f32 %v529_v35, %v2630_v1  ;;  %v588_v22 = vadd.f32 %v553_v14, %v2601_v56  ;;  %v609_v62 = vmul.f32 2.4738085e-06, %v2583_v55  ;;  %v1944_v21 = vpop.permute.xlu1 %1943  ;;  %v1934_v11 = vpop.permute.xlu0 %1933  ;;  %v129_v48 = vmax.f32 %v3102_v49, %v73_v54 }
  0x90   :  { %v610_v26 = vmul.f32 2.4738085e-06, %v2585_v9  ;;  %v589_v57 = vadd.f32 %v554_v28, %v2604_v16  ;;  %v590_v2 = vadd.f32 %v555_v7, %v2607_v17  ;;  %v591_v39 = vadd.f32 %v556_v38, %v2611_v44 }
  0x91   :  { %v611_v63 = vmul.f32 2.4738085e-06, %v2587_v42  ;;  %v2009_v13 = vmul.f32 %v1944_v21, %v2564_v18  ;;  %v2007_v43 = vmul.f32 %v1934_v11, %v1895_v53  ;;  %v592_v23 = vadd.f32 %v557_v40, %v2614_v6  ;;  %v3103_v40 = vld [vmem:[#allocation12_spill] sm:$0xff] }
  0x92   :  { %v612_v51 = vmul.f32 2.4738085e-06, %v2589_v10  ;;  %v613_v46 = vmul.f32 2.4738085e-06, %v2591_v3  ;;  %v622_v20 = vadd.f32 %v608_v45, %v587_v8  ;;  %v623_v32 = vadd.f32 %v609_v62, %v588_v22  ;;  %v3104_v21 = vld [vmem:[#allocation28_spill] sm:$0xff] }
  0x93   :  { %v624_v27 = vadd.f32 %v610_v26, %v589_v57  ;;  %2026 = vst.msk [vmem:[#allocation5 + $0xc] sm:$0xf] %vm2022_vm3, %v2009_v13  ;;  %2024 = vst.msk [vmem:[#allocation5 + $0x4] sm:$0xf] %vm2022_vm3, %v2007_v43  ;;  %v625_v5 = vadd.f32 %v611_v63, %v590_v2  ;;  %v137_v18 = vmax.f32 %v73_v54, %v2662_v59  ;;  %v411_v22 = vmul.f32 0.0025662559, %v3103_v40 }
  0x94   :  { %v626_v31 = vadd.f32 %v612_v51, %v591_v39  ;;  %v627_v53 = vadd.f32 %v613_v46, %v592_v23  ;;  %v654_v33 = vmul.f32 0.0025662559, %v622_v20  ;;  %v678_v30 = vmul.f32 0.16552375, %v623_v32  ;;  %v3106_v57 = vld [vmem:[#allocation22_spill] sm:$0xff]  ;;  %v82_v43 = vld [vmem:[#allocation2 + $0x1c0] sm:$0xff] }
  0x95   :  { %v704_v60 = vmul.f32 0.663815, %v624_v27  ;;  %v679_v37 = vmul.f32 0.16552375, %v625_v5  ;;  %v645_v41 = vmul.f32 2.4738085e-06, %v623_v32  ;;  %v180_v45 = vmax.f32 %v2442_v58, %v129_v48 }
  0x96   :  { %v656_v12 = vmul.f32 0.0025662559, %v626_v31  ;;  %v690_v35 = vadd.f32 %v678_v30, %v654_v33  ;;  %v768_v14 = vmul.f32 2.4738085e-06, %v627_v53  ;;  %v646_v28 = vmul.f32 2.4738085e-06, %v625_v5 }
  0x97   :  { %v655_v7 = vmul.f32 0.0025662559, %v624_v27  ;;  %v703_v38 = vmul.f32 0.663815, %v622_v20  ;;  %v187_v4 = vmax.f32 %v2467_v29, %v137_v18  ;;  %v278_v8 = vrot.slane %v180_v45, 1  ;;  %v3108_v54 = vld [vmem:[#allocation46_spill] sm:$0xff] }
  0x98   :  { %v720_v62 = vadd.f32 %v704_v60, %v690_v35  ;;  %v2676_v11 = vmul.f32 0.16552375, %v3104_v21  ;;  %v502_v2 = vmul.f32 0.663815, %v3106_v57  ;;  %v474_v13 = vadd.f32 %v3108_v54, %v411_v22  ;;  %v83_v20 = vld [vmem:[#allocation2 + $0x1c8] sm:$0xff]  ;;  %v84_v48 = vld [vmem:[#allocation2 + $0x1d0] sm:$0xff] }
  0x99   :  { %v667_v26 = vadd.f32 %v655_v7, %v645_v41  ;;  %v735_v39 = vadd.f32 %v703_v38, %v678_v30  ;;  %v285_v63 = vrot.slane %v187_v4, 1  ;;  %v2679_v58 = vmax.f32 %v180_v45, %v278_v8  ;;  %v85_v18 = vld [vmem:[#allocation2 + $0x1d8] sm:$0xff]  ;;  %v86_v41 = vld [vmem:[#allocation2 + $0x1e0] sm:$0xff]  ;;  %v87_v45 = vld [vmem:[#allocation2 + $0x1e8] sm:$0xff] }
  0x9a   :  { %3105 = vst [vmem:[#allocation23_spill] sm:$0xff] %v2676_v11  ;;  %v736_v23 = vadd.f32 %v720_v62, %v679_v37  ;;  %v668_v51 = vadd.f32 %v656_v12, %v646_v28  ;;  %v680_v29 = vmul.f32 0.16552375, %v627_v53  ;;  %v530_v49 = vadd.f32 %v502_v2, %v474_v13  ;;  %v88_v38 = vld [vmem:[#allocation2 + $0x1f0] sm:$0xff]  ;;  %v3112_v62 = vld [vmem:[#allocation53_spill] sm:$0xff]  ;;  %v3114_v2 = vld [vmem:[#allocation55_spill] sm:$0xff] }
  0x9b   :  { %3107 = vst [vmem:[#allocation41_spill] sm:$0xff] %v2679_v58  ;;  %v691_v46 = vadd.f32 %v679_v37, %v667_v26  ;;  %v755_v32 = vadd.f32 %v735_v39, %v655_v7  ;;  %v2682_v27 = vmax.f32 %v187_v4, %v285_v63  ;;  %v2685_v5 = vmul.f32 0.0025662559, %v2679_v58  ;;  %v3111_v4 = vld [vmem:[#allocation51_spill] sm:$0xff]  ;;  %v3116_v13 = vld [vmem:[#allocation8_spill] sm:$0xff] }
  0x9c   :  { %v756_v33 = vadd.f32 %v736_v23, %v656_v12  ;;  %v2687_v30 = vadd.f32 %v680_v29, %v668_v51  ;;  %v705_v60 = vmul.f32 0.663815, %v626_v31  ;;  %v138_v35 = vmax.f32 %v2414_v34, %v82_v43  ;;  %v3113_v12 = vld [vmem:[#allocation54_spill] sm:$0xff]  ;;  %v3115_v34 = vld [vmem:[#allocation56_spill] sm:$0xff] }
  0x9d   :  { %3109 = vst [vmem:[#allocation24_spill] sm:$0xff] %v2682_v27  ;;  %3110 = vst [vmem:[#allocation25_spill] sm:$0xff] %v2685_v5  ;;  %v775_v53 = vadd.f32 %v755_v32, %v646_v28  ;;  %v558_v37 = vadd.f32 %v530_v49, %v2676_v11  ;;  %v614_v7 = vmul.f32 2.4738085e-06, %v2682_v27  ;;  %v139_v8 = vmax.f32 %v3111_v4, %v83_v20 }
  0x9e   :  { %v776_v40 = vadd.f32 %v768_v14, %v756_v33  ;;  %v721_v22 = vadd.f32 %v705_v60, %v691_v46  ;;  %v140_v26 = vmax.f32 %v3112_v62, %v84_v48  ;;  %v141_v21 = vmax.f32 %v3113_v12, %v85_v18 }
  0x9f   :  { %v807_v57 = vrot.slane %v775_v53, 5  ;;  %v593_v31 = vadd.f32 %v558_v37, %v2685_v5  ;;  %v2697_v39 = vmax.f32 %v3114_v2, %v86_v41  ;;  %v2700_v28 = vmax.f32 %v3115_v34, %v87_v45 }
  0xa0   :  { %v808_v63 = vrot.slane %v776_v40, 5  ;;  %v2702_v54 = vadd.f32 %v721_v22, %v680_v29  ;;  %v2705_v43 = vmax.f32 %v3116_v13, %v88_v38  ;;  %v2707_v14 = vmax.f32 %v138_v35, %v139_v8 }
  0xa1   :  { %v840_v23 = vsel %vm835_vm0, 0.0, %v807_v57  ;;  %v857_v51 = vsel %vm852_vm1, %v807_v57, 0.0  ;;  %v2711_v46 = vadd.f32 %v614_v7, %v593_v31  ;;  %v2713_v20 = vmax.f32 %v139_v8, %v140_v26 }
  0xa2   :  { %v841_v32 = vsel %vm835_vm0, 0.0, %v808_v63  ;;  %v858_v49 = vsel %vm852_vm1, %v808_v63, 0.0  ;;  %v2717_v48 = vmul.f32 2.4738085e-06, %v840_v23  ;;  %v889_v29 = vmul.f32 0.0025662559, %v840_v23 }
  0xa3   :  { %v874_v18 = vmul.f32 2.4738085e-06, %v841_v32  ;;  %v890_v33 = vmul.f32 0.0025662559, %v841_v32  ;;  %v970_v60 = vmul.f32 0.16552375, %v841_v32  ;;  %v2719_v41 = vmax.f32 %v140_v26, %v141_v21 }
  0xa4   :  { %v1050_v45 = vmul.f32 0.663815, %v841_v32  ;;  %v1290_v35 = vmul.f32 2.4738085e-06, %v858_v49  ;;  %v1370_v53 = vmul.f32 0.16552375, %v858_v49  ;;  %v2722_v37 = vmax.f32 %v141_v21, %v2697_v39 }
  0xa5   :  { %v922_v7 = vrot.slane %v890_v33, 1  ;;  %v1002_v38 = vrot.slane %v970_v60, 2  ;;  %v1130_v4 = vrot.slane %v970_v60, 4  ;;  %v1178_v8 = vrot.slane %v890_v33, 5 }
  0xa6   :  { %v1082_v40 = vrot.slane %v1050_v45, 3  ;;  %v1242_v22 = vrot.slane %v874_v18, 6  ;;  %v1322_v62 = vrot.slane %v1290_v35, 6  ;;  %v1402_v12 = vrot.slane %v1370_v53, 4 }
  0xa7   :  { %v954_v57 = vadd.f32 %v922_v7, %v874_v18  ;;  %v1450_v31 = vmul.f32 0.0025662559, %v858_v49  ;;  %v1546_v2 = vrot.slane %v1370_v53, 2  ;;  %v1594_v34 = vmul.f32 0.663815, %v858_v49 }
  0xa8   :  { %v921_v26 = vrot.slane %v889_v29, 1  ;;  %v969_v63 = vmul.f32 0.16552375, %v840_v23  ;;  %v1049_v13 = vmul.f32 0.663815, %v840_v23  ;;  %v1177_v32 = vrot.slane %v889_v29, 5 }
  0xa9   :  { %v1034_v5 = vadd.f32 %v1002_v38, %v954_v57  ;;  %v1482_v6 = vrot.slane %v1450_v31, 5  ;;  %v1578_v21 = vadd.f32 %v1546_v2, %v954_v57  ;;  %v1626_v44 = vrot.slane %v1594_v34, 3 }
  0xaa   :  { %v953_v17 = vadd.f32 %v921_v26, %v2717_v48  ;;  %v1001_v60 = vrot.slane %v969_v63, 2  ;;  %v1081_v33 = vrot.slane %v1049_v13, 3  ;;  %v1129_v45 = vrot.slane %v969_v63, 4 }
  0xab   :  { %v1114_v16 = vadd.f32 %v1082_v40, %v1034_v5  ;;  %v1658_v35 = vadd.f32 %v1626_v44, %v1578_v21  ;;  %v1241_v18 = vrot.slane %v2717_v48, 6  ;;  %v1289_v7 = vmul.f32 2.4738085e-06, %v857_v51 }
  0xac   :  { %v1033_v53 = vadd.f32 %v1001_v60, %v953_v17  ;;  %v1369_v49 = vmul.f32 0.16552375, %v857_v51  ;;  %v1449_v58 = vmul.f32 0.0025662559, %v857_v51  ;;  %v1593_v56 = vmul.f32 0.663815, %v857_v51 }
  0xad   :  { %v1162_v23 = vadd.f32 %v1130_v4, %v1114_v16  ;;  %v1434_v29 = vadd.f32 %v1402_v12, %v1114_v16  ;;  %v1674_v38 = vadd.f32 %v1658_v35, %v1402_v12  ;;  %v1321_v31 = vrot.slane %v1289_v7, 6 }
  0xae   :  { %v1113_v57 = vadd.f32 %v1081_v33, %v1033_v53  ;;  %v1401_v2 = vrot.slane %v1369_v49, 4  ;;  %v1481_v34 = vrot.slane %v1449_v58, 5  ;;  %v1545_v26 = vrot.slane %v1369_v49, 2  ;;  %v1954_v49 = vpop.permute.xlu1 %1953 }
  0xaf   :  { %v1210_v11 = vadd.f32 %v1178_v8, %v1162_v23  ;;  %v1514_v13 = vadd.f32 %v1482_v6, %v1434_v29  ;;  %v1690_v63 = vadd.f32 %v1674_v38, %v1482_v6  ;;  %v1625_v5 = vrot.slane %v1593_v56, 3 }
  0xb0   :  { %v1161_v44 = vadd.f32 %v1129_v45, %v1113_v57  ;;  %v1433_v40 = vadd.f32 %v1401_v2, %v1113_v57  ;;  %v1577_v48 = vadd.f32 %v1545_v26, %v953_v17  ;;  %v706_v21 = vmul.f32 0.663815, %v2711_v46 }
  0xb1   :  { %v1274_v60 = vadd.f32 %v1242_v22, %v1210_v11  ;;  %v1354_v27 = vadd.f32 %v1322_v62, %v1210_v11  ;;  %v1530_v51 = vadd.f32 %v1514_v13, %v1322_v62  ;;  %v1706_v4 = vadd.f32 %v1690_v63, %v1322_v62 }
  0xb2   :  { %v1209_v16 = vadd.f32 %v1177_v32, %v1161_v44  ;;  %v1513_v12 = vadd.f32 %v1481_v34, %v1433_v40  ;;  %v1657_v35 = vadd.f32 %v1625_v5, %v1577_v48  ;;  %v722_v33 = vadd.f32 %v706_v21, %v2687_v30 }
  0xb3   :  { %v1738_v58 = vrot.slane %v1354_v27, 1  ;;  %v1786_v7 = vrot.slane %v1530_v51, 2  ;;  %v1834_v8 = vrot.slane %v1706_v4, 3  ;;  %v748_v6 = vmul.f32 0.0025662559, %v2711_v46 }
  0xb4   :  { %v1273_v56 = vadd.f32 %v1241_v18, %v1209_v16  ;;  %v1353_v45 = vadd.f32 %v1321_v31, %v1209_v16  ;;  %v1529_v53 = vadd.f32 %v1513_v12, %v1321_v31  ;;  %v1673_v17 = vadd.f32 %v1657_v35, %v1401_v2 }
  0xb5   :  { %v1867_v22 = vsel %vm1861_vm2, %v1274_v60, %v1738_v58  ;;  %v810_v11 = vrot.slane %v722_v33, 5  ;;  %v757_v62 = vadd.f32 %v748_v6, %v2702_v54  ;;  %v2733_v32 = vmax.f32 %v2697_v39, %v2700_v28 }
  0xb6   :  { %v1883_v27 = vsel %vm852_vm1, %v1867_v22, %v1786_v7  ;;  %v1689_v30 = vadd.f32 %v1673_v17, %v1481_v34  ;;  %v1737_v23 = vrot.slane %v1353_v45, 1  ;;  %v1785_v29 = vrot.slane %v1529_v53, 2  ;;  %v1949_v34 = vpop.permute.xlu0 %1948 }
  0xb7   :  { %v1899_v46 = vsel %vm835_vm0, %v1883_v27, %v1834_v8  ;;  %v843_v18 = vsel %vm835_vm0, 0.0, %v810_v11  ;;  %v860_v38 = vsel %vm852_vm1, %v810_v11, 0.0  ;;  %v809_v57 = vrot.slane %v757_v62, 5 }
  0xb8   :  { %v2011_v2 = vmul.f32 %v1954_v49, %v1899_v46  ;;  %v1705_v26 = vadd.f32 %v1689_v30, %v1321_v31  ;;  %v1866_v54 = vsel %vm1861_vm2, %v1273_v56, %v1737_v23  ;;  %v876_v13 = vmul.f32 2.4738085e-06, %v843_v18 }
  0xb9   :  { %v1882_v39 = vsel %vm852_vm1, %v1866_v54, %v1785_v29  ;;  %v892_v63 = vmul.f32 0.0025662559, %v843_v18  ;;  %v972_v5 = vmul.f32 0.16552375, %v843_v18  ;;  %v1052_v44 = vmul.f32 0.663815, %v843_v18 }
  0xba   :  { %2028 = vst.msk [vmem:[#allocation5 + $0x14] sm:$0xf] %vm2022_vm3, %v2011_v2  ;;  %v1833_v40 = vrot.slane %v1705_v26, 3  ;;  %v1244_v48 = vrot.slane %v876_v13, 6  ;;  %v1292_v21 = vmul.f32 2.4738085e-06, %v860_v38  ;;  %v2747_v49 = vmax.f32 %v2700_v28, %v2705_v43 }
  0xbb   :  { %v1372_v60 = vmul.f32 0.16552375, %v860_v38  ;;  %v924_v51 = vrot.slane %v892_v63, 1  ;;  %v1004_v4 = vrot.slane %v972_v5, 2  ;;  %v1084_v16 = vrot.slane %v1052_v44, 3 }
  0xbc   :  { %v1132_v12 = vrot.slane %v972_v5, 4  ;;  %v1898_v31 = vsel %vm835_vm0, %v1882_v39, %v1833_v40  ;;  %v1180_v35 = vrot.slane %v892_v63, 5  ;;  %v1324_v33 = vrot.slane %v1292_v21, 6 }
  0xbd   :  { %v1404_v58 = vrot.slane %v1372_v60, 4  ;;  %v2010_v7 = vmul.f32 %v1949_v34, %v1898_v31  ;;  %v956_v8 = vadd.f32 %v924_v51, %v876_v13  ;;  %v1452_v6 = vmul.f32 0.0025662559, %v860_v38 }
  0xbe   :  { %v1548_v56 = vrot.slane %v1372_v60, 2  ;;  %v1596_v45 = vmul.f32 0.663815, %v860_v38  ;;  %v842_v53 = vsel %vm835_vm0, 0.0, %v809_v57  ;;  %v859_v17 = vsel %vm852_vm1, %v809_v57, 0.0 }
  0xbf   :  { %2027 = vst.msk [vmem:[#allocation5 + $0x10] sm:$0xf] %vm2022_vm3, %v2010_v7  ;;  %v1036_v22 = vadd.f32 %v1004_v4, %v956_v8  ;;  %v1484_v11 = vrot.slane %v1452_v6, 5  ;;  %v875_v27 = vmul.f32 2.4738085e-06, %v842_v53  ;;  %v286_v46 = vrot.slane %v2707_v14, 1 }
  0xc0   :  { %v1580_v62 = vadd.f32 %v1548_v56, %v956_v8  ;;  %v1628_v30 = vrot.slane %v1596_v45, 3  ;;  %v891_v23 = vmul.f32 0.0025662559, %v842_v53  ;;  %v971_v29 = vmul.f32 0.16552375, %v842_v53 }
  0xc1   :  { %v1116_v18 = vadd.f32 %v1084_v16, %v1036_v22  ;;  %v1051_v38 = vmul.f32 0.663815, %v842_v53  ;;  %v1243_v2 = vrot.slane %v875_v27, 6  ;;  %v1291_v26 = vmul.f32 2.4738085e-06, %v859_v17 }
  0xc2   :  { %v1660_v57 = vadd.f32 %v1628_v30, %v1580_v62  ;;  %v923_v54 = vrot.slane %v891_v23, 1  ;;  %v1003_v13 = vrot.slane %v971_v29, 2  ;;  %v1131_v28 = vrot.slane %v971_v29, 4 }
  0xc3   :  { %v1164_v39 = vadd.f32 %v1132_v12, %v1116_v18  ;;  %v1436_v63 = vadd.f32 %v1404_v58, %v1116_v18  ;;  %v1083_v5 = vrot.slane %v1051_v38, 3  ;;  %v1179_v44 = vrot.slane %v891_v23, 5 }
  0xc4   :  { %v1676_v34 = vadd.f32 %v1660_v57, %v1404_v58  ;;  %v955_v40 = vadd.f32 %v923_v54, %v875_v27  ;;  %v1323_v21 = vrot.slane %v1291_v26, 6  ;;  %v1371_v60 = vmul.f32 0.16552375, %v859_v17  ;;  %v1964_v57 = vpop.permute.xlu1 %1963 }
  0xc5   :  { %v1212_v51 = vadd.f32 %v1180_v35, %v1164_v39  ;;  %v1516_v4 = vadd.f32 %v1484_v11, %v1436_v63  ;;  %v1451_v31 = vmul.f32 0.0025662559, %v859_v17  ;;  %v1595_v7 = vmul.f32 0.663815, %v859_v17 }
  0xc6   :  { %v1692_v16 = vadd.f32 %v1676_v34, %v1484_v11  ;;  %v1035_v8 = vadd.f32 %v1003_v13, %v955_v40  ;;  %v1403_v6 = vrot.slane %v1371_v60, 4  ;;  %v1547_v56 = vrot.slane %v1371_v60, 2 }
  0xc7   :  { %v1276_v45 = vadd.f32 %v1244_v48, %v1212_v51  ;;  %v1356_v53 = vadd.f32 %v1324_v33, %v1212_v51  ;;  %v1532_v22 = vadd.f32 %v1516_v4, %v1324_v33  ;;  %v1483_v62 = vrot.slane %v1451_v31, 5 }
  0xc8   :  { %v1708_v12 = vadd.f32 %v1692_v16, %v1324_v33  ;;  %v1115_v30 = vadd.f32 %v1083_v5, %v1035_v8  ;;  %v1579_v29 = vadd.f32 %v1547_v56, %v955_v40  ;;  %v1627_v23 = vrot.slane %v1595_v7, 3 }
  0xc9   :  { %v1740_v58 = vrot.slane %v1356_v53, 1  ;;  %v1788_v27 = vrot.slane %v1532_v22, 2  ;;  %v287_v18 = vrot.slane %v2713_v20, 1  ;;  %v288_v35 = vrot.slane %v2719_v41, 1  ;;  %v3119_v22 = vld [vmem:[#allocation15_spill] sm:$0xff] }
  0xca   :  { %v1836_v38 = vrot.slane %v1708_v12, 3  ;;  %v1163_v17 = vadd.f32 %v1131_v28, %v1115_v30  ;;  %v1435_v11 = vadd.f32 %v1403_v6, %v1115_v30  ;;  %v1659_v26 = vadd.f32 %v1627_v23, %v1579_v29  ;;  %v3120_v12 = vld [vmem:[#allocation16_spill] sm:$0xff] }
  0xcb   :  { %v1869_v48 = vsel %vm1861_vm2, %v1276_v45, %v1740_v58  ;;  %v289_v54 = vrot.slane %v2722_v37, 1  ;;  %v290_v33 = vrot.slane %v2733_v32, 1  ;;  %v291_v13 = vrot.slane %v2747_v49, 1  ;;  %v3118_v45 = vld [vmem:[#allocation14_spill] sm:$0xff]  ;;  %v3122_v23 = vld [vmem:[#allocation36_spill] sm:$0xff] }
  0xcc   :  { %v1885_v39 = vsel %vm852_vm1, %v1869_v48, %v1788_v27  ;;  %v1211_v63 = vadd.f32 %v1179_v44, %v1163_v17  ;;  %v1515_v5 = vadd.f32 %v1483_v62, %v1435_v11  ;;  %v1675_v34 = vadd.f32 %v1659_v26, %v1403_v6  ;;  %v3124_v11 = vld [vmem:[#allocation38_spill] sm:$0xff] }
  0xcd   :  { %v1901_v40 = vsel %vm835_vm0, %v1885_v39, %v1836_v38  ;;  %v2760_v28 = vmax.f32 %v2707_v14, %v286_v46  ;;  %v2763_v60 = vmax.f32 %v2713_v20, %v287_v18  ;;  %v2766_v51 = vmax.f32 %v2719_v41, %v288_v35  ;;  %v3117_v41 = vld [vmem:[#allocation13_spill] sm:$0xff]  ;;  %v1959_v18 = vpop.permute.xlu0 %1958 }
  0xce   :  { %v2013_v4 = vmul.f32 %v1964_v57, %v1901_v40  ;;  %v1275_v31 = vadd.f32 %v1243_v2, %v1211_v63  ;;  %v1355_v7 = vadd.f32 %v1323_v21, %v1211_v63  ;;  %v1531_v16 = vadd.f32 %v1515_v5, %v1323_v21  ;;  %v3123_v38 = vld [vmem:[#allocation37_spill] sm:$0xff]  ;;  %v89_v57 = vld [vmem:[#allocation2 + $0x1f8] sm:$0xff] }
  0xcf   :  { %v1691_v8 = vadd.f32 %v1675_v34, %v1483_v62  ;;  %v2769_v44 = vmax.f32 %v2722_v37, %v289_v54  ;;  %v2772_v6 = vmax.f32 %v2733_v32, %v290_v33  ;;  %v2775_v14 = vmax.f32 %v2747_v49, %v291_v13  ;;  %v3121_v49 = vld [vmem:[#allocation35_spill] sm:$0xff] }
  0xd0   :  { %2030 = vst.msk [vmem:[#allocation5 + $0x1c] sm:$0xf] %vm2022_vm3, %v2013_v4  ;;  %v1739_v20 = vrot.slane %v1355_v7, 1  ;;  %v1787_v46 = vrot.slane %v1531_v16, 2  ;;  %v393_v56 = vmul.f32 2.4738085e-06, %v3117_v41 }
  0xd1   :  { %v394_v2 = vmul.f32 2.4738085e-06, %v3118_v45  ;;  %v1707_v53 = vadd.f32 %v1691_v8, %v1323_v21  ;;  %v395_v62 = vmul.f32 2.4738085e-06, %v3119_v22  ;;  %v396_v37 = vmul.f32 2.4738085e-06, %v3120_v12 }
  0xd2   :  { %v2783_v30 = vmul.f32 0.16552375, %v2581_v24  ;;  %v1868_v32 = vsel %vm1861_vm2, %v1275_v31, %v1739_v20  ;;  %v435_v29 = vadd.f32 %v3121_v49, %v393_v56  ;;  %v2789_v27 = vmul.f32 0.16552375, %v2583_v55  ;;  %v3125_v55 = vld [vmem:[#allocation39_spill] sm:$0xff]  ;;  %v3127_v7 = vld [vmem:[#allocation52_spill] sm:$0xff] }
  0xd3   :  { %v436_v58 = vadd.f32 %v3122_v23, %v394_v2  ;;  %v1835_v35 = vrot.slane %v1707_v53, 3  ;;  %v1884_v21 = vsel %vm852_vm1, %v1868_v32, %v1787_v46  ;;  %v437_v17 = vadd.f32 %v3123_v38, %v395_v62  ;;  %v3126_v40 = vld [vmem:[#allocation47_spill] sm:$0xff] }
  0xd4   :  { %v438_v26 = vadd.f32 %v3124_v11, %v396_v37  ;;  %v2795_v24 = vmul.f32 0.16552375, %v2585_v9  ;;  %v2798_v48 = vmul.f32 0.16552375, %v2587_v42  ;;  %v2801_v54 = vmul.f32 0.16552375, %v2589_v10 }
  0xd5   :  { %v476_v33 = vadd.f32 %v2617_v25, %v3125_v55  ;;  %v1900_v13 = vsel %vm835_vm0, %v1884_v21, %v1835_v35  ;;  %v2807_v39 = vmul.f32 0.16552375, %v2591_v3  ;;  %v477_v63 = vadd.f32 %v2621_v50, %v435_v29  ;;  %v3130_v11 = vld [vmem:[#allocation23_spill] sm:$0xff] }
  0xd6   :  { %v478_v5 = vadd.f32 %v2624_v15, %v436_v58  ;;  %v2012_v9 = vmul.f32 %v1959_v18, %v1900_v13  ;;  %v479_v34 = vadd.f32 %v2627_v61, %v437_v17  ;;  %v480_v42 = vadd.f32 %v2630_v1, %v438_v26  ;;  %v3128_v58 = vld [vmem:[#allocation24_spill] sm:$0xff]  ;;  %v3129_v17 = vld [vmem:[#allocation43_spill] sm:$0xff]  ;;  %v3131_v13 = vld [vmem:[#allocation29_spill] sm:$0xff] }
  0xd7   :  { %v503_v10 = vmul.f32 0.663815, %v3126_v40  ;;  %v504_v4 = vmul.f32 0.663815, %v2567_v52  ;;  %v505_v25 = vmul.f32 0.663815, %v2570_v47  ;;  %v145_v3 = vmax.f32 %v2662_v59, %v89_v57 }
  0xd8   :  { %v506_v31 = vmul.f32 0.663815, %v2573_v0  ;;  %2029 = vst.msk [vmem:[#allocation5 + $0x18] sm:$0xf] %vm2022_vm3, %v2012_v9  ;;  %v507_v50 = vmul.f32 0.663815, %v2576_v36  ;;  %v481_v26 = vadd.f32 %v3130_v11, %v3129_v17 }
  0xd9   :  { %v508_v15 = vmul.f32 0.663815, %v2579_v19  ;;  %v531_v61 = vadd.f32 %v503_v10, %v3127_v7  ;;  %v573_v1 = vmul.f32 0.0025662559, %v2760_v28  ;;  %v532_v16 = vadd.f32 %v504_v4, %v476_v33  ;;  %v3133_v4 = vld [vmem:[#allocation41_spill] sm:$0xff] }
  0xda   :  { %v533_v8 = vadd.f32 %v505_v25, %v477_v63  ;;  %v534_v20 = vadd.f32 %v506_v31, %v478_v5  ;;  %v574_v52 = vmul.f32 0.0025662559, %v2763_v60  ;;  %v535_v47 = vadd.f32 %v507_v50, %v479_v34  ;;  %v3132_v63 = vld [vmem:[#allocation9_spill] sm:$0xff]  ;;  %v3134_v31 = vld [vmem:[#allocation30_spill] sm:$0xff] }
  0xdb   :  { %v536_v46 = vadd.f32 %v508_v15, %v480_v42  ;;  %v559_v0 = vadd.f32 %v531_v61, %v2783_v30  ;;  %v575_v59 = vmul.f32 0.0025662559, %v2766_v51  ;;  %v560_v41 = vadd.f32 %v532_v16, %v2789_v27 }
  0xdc   :  { %v561_v36 = vadd.f32 %v533_v8, %v2795_v24  ;;  %v562_v19 = vadd.f32 %v534_v20, %v2798_v48  ;;  %v576_v56 = vmul.f32 0.0025662559, %v2769_v44  ;;  %v563_v45 = vadd.f32 %v535_v47, %v2801_v54 }
  0xdd   :  { %v564_v2 = vadd.f32 %v536_v46, %v2807_v39  ;;  %v577_v53 = vmul.f32 0.0025662559, %v2772_v6  ;;  %v578_v22 = vmul.f32 0.0025662559, %v2775_v14  ;;  %v594_v62 = vadd.f32 %v573_v1, %v559_v0 }
  0xde   :  { %v595_v12 = vadd.f32 %v574_v52, %v560_v41  ;;  %v596_v37 = vadd.f32 %v575_v59, %v561_v36  ;;  %v597_v32 = vadd.f32 %v576_v56, %v562_v19  ;;  %v194_v23 = vmax.f32 %v2705_v43, %v145_v3  ;;  %v3135_v3 = vld [vmem:[#allocation10_spill] sm:$0xff]  ;;  %v3136_v59 = vld [vmem:[#allocation31_spill] sm:$0xff]  ;;  %v3137_v41 = vld [vmem:[#allocation57_spill] sm:$0xff] }
  0xdf   :  { %v598_v49 = vadd.f32 %v577_v53, %v563_v45  ;;  %v599_v29 = vadd.f32 %v578_v22, %v564_v2  ;;  %v2836_v18 = vmul.f32 0.16552375, %v3128_v58  ;;  %v657_v35 = vmul.f32 0.0025662559, %v594_v62  ;;  %v3138_v2 = vld [vmem:[#allocation32_spill] sm:$0xff] }
  0xe0   :  { %v681_v21 = vmul.f32 0.16552375, %v595_v12  ;;  %v682_v38 = vmul.f32 0.16552375, %v597_v32  ;;  %v708_v55 = vmul.f32 0.663815, %v596_v37  ;;  %v441_v5 = vadd.f32 %v3132_v63, %v3131_v13 }
  0xe1   :  { %v659_v57 = vmul.f32 0.0025662559, %v598_v49  ;;  %v769_v33 = vmul.f32 2.4738085e-06, %v599_v29  ;;  %v647_v34 = vmul.f32 2.4738085e-06, %v595_v12  ;;  %v442_v50 = vadd.f32 %v3135_v3, %v3134_v31 }
  0xe2   :  { %v693_v9 = vadd.f32 %v681_v21, %v657_v35  ;;  %v648_v42 = vmul.f32 2.4738085e-06, %v597_v32  ;;  %v658_v40 = vmul.f32 0.0025662559, %v596_v37  ;;  %v707_v43 = vmul.f32 0.663815, %v594_v62 }
  0xe3   :  { %v292_v10 = vrot.slane %v194_v23, 1  ;;  %v509_v25 = vmul.f32 0.663815, %v3133_v4  ;;  %v683_v1 = vmul.f32 0.16552375, %v599_v29  ;;  %v443_v36 = vadd.f32 %v3137_v41, %v3136_v59  ;;  %v3139_v53 = vld [vmem:[#allocation40_spill] sm:$0xff] }
  0xe4   :  { %v724_v15 = vadd.f32 %v708_v55, %v693_v9  ;;  %v670_v7 = vadd.f32 %v658_v40, %v647_v34  ;;  %v671_v61 = vadd.f32 %v659_v57, %v648_v42  ;;  %v739_v16 = vadd.f32 %v707_v43, %v681_v21  ;;  %v3140_v37 = vld [vmem:[#allocation33_spill] sm:$0xff]  ;;  %v3141_v32 = vld [vmem:[#allocation58_spill] sm:$0xff] }
  0xe5   :  { %v2845_v8 = vmax.f32 %v194_v23, %v292_v10  ;;  %v537_v20 = vadd.f32 %v509_v25, %v481_v26  ;;  %v709_v52 = vmul.f32 0.663815, %v598_v49  ;;  %v444_v22 = vadd.f32 %v3139_v53, %v3138_v2  ;;  %v3142_v49 = vld [vmem:[#allocation50_spill] sm:$0xff] }
  0xe6   :  { %v740_v47 = vadd.f32 %v724_v15, %v682_v38  ;;  %v695_v46 = vadd.f32 %v683_v1, %v671_v61  ;;  %v694_v0 = vadd.f32 %v682_v38, %v670_v7  ;;  %v759_v19 = vadd.f32 %v739_v16, %v658_v40 }
  0xe7   :  { %v565_v56 = vadd.f32 %v537_v20, %v2836_v18  ;;  %v579_v45 = vmul.f32 0.0025662559, %v2845_v8  ;;  %v445_v29 = vadd.f32 %v3141_v32, %v3140_v37  ;;  %v482_v23 = vadd.f32 %v2783_v30, %v3142_v49 }
  0xe8   :  { %v760_v62 = vadd.f32 %v740_v47, %v659_v57  ;;  %v725_v12 = vadd.f32 %v709_v52, %v694_v0  ;;  %v779_v58 = vadd.f32 %v759_v19, %v648_v42  ;;  %v483_v21 = vadd.f32 %v2789_v27, %v441_v5  ;;  %v3143_v5 = vld [vmem:[#allocation34_spill] sm:$0xff] }
  0xe9   :  { %v600_v35 = vadd.f32 %v579_v45, %v565_v56  ;;  %v2859_v38 = vadd.f32 %v2795_v24, %v442_v50  ;;  %v2862_v26 = vadd.f32 %v2798_v48, %v443_v36  ;;  %v2865_v57 = vadd.f32 %v2801_v54, %v444_v22 }
  0xea   :  { %v780_v17 = vadd.f32 %v769_v33, %v760_v62  ;;  %v741_v11 = vadd.f32 %v725_v12, %v683_v1  ;;  %v811_v55 = vrot.slane %v779_v58, 5  ;;  %v2868_v30 = vadd.f32 %v2807_v39, %v445_v29  ;;  %v3144_v33 = vld [vmem:[#allocation25_spill] sm:$0xff] }
  0xeb   :  { %v710_v13 = vmul.f32 0.663815, %v600_v35  ;;  %v749_v63 = vmul.f32 0.0025662559, %v600_v35  ;;  %v510_v27 = vmul.f32 0.663815, %v2760_v28  ;;  %v2874_v34 = vadd.f32 %v3144_v33, %v3143_v5 }
  0xec   :  { %v812_v9 = vrot.slane %v780_v17, 5  ;;  %v511_v24 = vmul.f32 0.663815, %v2763_v60  ;;  %v844_v48 = vsel %vm835_vm0, 0.0, %v811_v55  ;;  %v861_v54 = vsel %vm852_vm1, %v811_v55, 0.0 }
  0xed   :  { %v2878_v42 = vadd.f32 %v710_v13, %v695_v46  ;;  %v2880_v40 = vadd.f32 %v749_v63, %v741_v11  ;;  %v2884_v10 = vmul.f32 2.4738085e-06, %v844_v48  ;;  %v893_v28 = vmul.f32 0.0025662559, %v844_v48 }
  0xee   :  { %v845_v39 = vsel %vm835_vm0, 0.0, %v812_v9  ;;  %v862_v43 = vsel %vm852_vm1, %v812_v9, 0.0  ;;  %v2886_v31 = vadd.f32 %v510_v27, %v482_v23  ;;  %v2888_v7 = vadd.f32 %v511_v24, %v483_v21 }
  0xef   :  { %v878_v60 = vmul.f32 2.4738085e-06, %v845_v39  ;;  %v894_v4 = vmul.f32 0.0025662559, %v845_v39  ;;  %v974_v25 = vmul.f32 0.16552375, %v845_v39 }
  0xf0   :  { %v1054_v3 = vmul.f32 0.663815, %v845_v39  ;;  %v1294_v50 = vmul.f32 2.4738085e-06, %v862_v43  ;;  %v1374_v15 = vmul.f32 0.16552375, %v862_v43 }
  0xf1   :  { %v926_v61 = vrot.slane %v894_v4, 1  ;;  %v1006_v1 = vrot.slane %v974_v25, 2  ;;  %v1134_v16 = vrot.slane %v974_v25, 4  ;;  %v1182_v20 = vrot.slane %v894_v4, 5 }
  0xf2   :  { %v1086_v52 = vrot.slane %v1054_v3, 3  ;;  %v1246_v47 = vrot.slane %v878_v60, 6  ;;  %v1326_v46 = vrot.slane %v1294_v50, 6  ;;  %v1406_v0 = vrot.slane %v1374_v15, 4 }
  0xf3   :  { %v958_v59 = vadd.f32 %v926_v61, %v878_v60  ;;  %v1454_v41 = vmul.f32 0.0025662559, %v862_v43  ;;  %v1550_v36 = vrot.slane %v1374_v15, 2  ;;  %v1598_v19 = vmul.f32 0.663815, %v862_v43 }
  0xf4   :  { %v925_v56 = vrot.slane %v893_v28, 1  ;;  %v973_v45 = vmul.f32 0.16552375, %v844_v48  ;;  %v1053_v2 = vmul.f32 0.663815, %v844_v48  ;;  %v1181_v53 = vrot.slane %v893_v28, 5 }
  0xf5   :  { %v1038_v22 = vadd.f32 %v1006_v1, %v958_v59  ;;  %v1486_v62 = vrot.slane %v1454_v41, 5  ;;  %v1582_v12 = vadd.f32 %v1550_v36, %v958_v59  ;;  %v1630_v37 = vrot.slane %v1598_v19, 3 }
  0xf6   :  { %v957_v32 = vadd.f32 %v925_v56, %v2884_v10  ;;  %v1005_v29 = vrot.slane %v973_v45, 2  ;;  %v1085_v49 = vrot.slane %v1053_v2, 3  ;;  %v1133_v23 = vrot.slane %v973_v45, 4 }
  0xf7   :  { %v1118_v58 = vadd.f32 %v1086_v52, %v1038_v22  ;;  %v1662_v35 = vadd.f32 %v1630_v37, %v1582_v12  ;;  %v1245_v21 = vrot.slane %v2884_v10, 6  ;;  %v1293_v17 = vmul.f32 2.4738085e-06, %v861_v54  ;;  %v1974_v12 = vpop.permute.xlu1 %1973 }
  0xf8   :  { %v1037_v11 = vadd.f32 %v1005_v29, %v957_v32  ;;  %v1373_v55 = vmul.f32 0.16552375, %v861_v54  ;;  %v1453_v13 = vmul.f32 0.0025662559, %v861_v54  ;;  %v1597_v63 = vmul.f32 0.663815, %v861_v54 }
  0xf9   :  { %v1166_v9 = vadd.f32 %v1134_v16, %v1118_v58  ;;  %v1438_v27 = vadd.f32 %v1406_v0, %v1118_v58  ;;  %v1678_v24 = vadd.f32 %v1662_v35, %v1406_v0  ;;  %v1325_v5 = vrot.slane %v1293_v17, 6 }
  0xfa   :  { %v1117_v33 = vadd.f32 %v1085_v49, %v1037_v11  ;;  %v1405_v48 = vrot.slane %v1373_v55, 4  ;;  %v1485_v39 = vrot.slane %v1453_v13, 5  ;;  %v1549_v43 = vrot.slane %v1373_v55, 2 }
  0xfb   :  { %v1214_v28 = vadd.f32 %v1182_v20, %v1166_v9  ;;  %v1518_v60 = vadd.f32 %v1486_v62, %v1438_v27  ;;  %v1694_v4 = vadd.f32 %v1678_v24, %v1486_v62  ;;  %v1629_v25 = vrot.slane %v1597_v63, 3 }
  0xfc   :  { %v1165_v3 = vadd.f32 %v1133_v23, %v1117_v33  ;;  %v1437_v50 = vadd.f32 %v1405_v48, %v1117_v33  ;;  %v1581_v10 = vadd.f32 %v1549_v43, %v957_v32  ;;  %v814_v15 = vrot.slane %v2878_v42, 5  ;;  %v1969_v33 = vpop.permute.xlu0 %1968 }
  0xfd   :  { %v1278_v61 = vadd.f32 %v1246_v47, %v1214_v28  ;;  %v1358_v1 = vadd.f32 %v1326_v46, %v1214_v28  ;;  %v1534_v54 = vadd.f32 %v1518_v60, %v1326_v46  ;;  %v1710_v16 = vadd.f32 %v1694_v4, %v1326_v46 }
  0xfe   :  { %v1213_v52 = vadd.f32 %v1181_v53, %v1165_v3  ;;  %v1517_v0 = vadd.f32 %v1485_v39, %v1437_v50  ;;  %v1661_v59 = vadd.f32 %v1629_v25, %v1581_v10  ;;  %v847_v41 = vsel %vm835_vm0, 0.0, %v814_v15 }
  0xff   :  { %v1742_v36 = vrot.slane %v1358_v1, 1  ;;  %v1790_v19 = vrot.slane %v1534_v54, 2  ;;  %v1838_v20 = vrot.slane %v1710_v16, 3  ;;  %v864_v56 = vsel %vm852_vm1, %v814_v15, 0.0 }
 0x100   :  { %v1277_v45 = vadd.f32 %v1245_v21, %v1213_v52  ;;  %v1357_v2 = vadd.f32 %v1325_v5, %v1213_v52  ;;  %v1533_v22 = vadd.f32 %v1517_v0, %v1325_v5  ;;  %v1677_v62 = vadd.f32 %v1661_v59, %v1405_v48 }
 0x101   :  { %v1871_v42 = vsel %vm1861_vm2, %v1278_v61, %v1742_v36  ;;  %v880_v47 = vmul.f32 2.4738085e-06, %v847_v41  ;;  %v896_v37 = vmul.f32 0.0025662559, %v847_v41  ;;  %v976_v46 = vmul.f32 0.16552375, %v847_v41 }
 0x102   :  { %v1887_v53 = vsel %vm852_vm1, %v1871_v42, %v1790_v19  ;;  %v1693_v32 = vadd.f32 %v1677_v62, %v1485_v39  ;;  %v1741_v29 = vrot.slane %v1357_v2, 1  ;;  %v1789_v49 = vrot.slane %v1533_v22, 2 }
 0x103   :  { %v1903_v23 = vsel %vm835_vm0, %v1887_v53, %v1838_v20  ;;  %v928_v58 = vrot.slane %v896_v37, 1  ;;  %v1008_v35 = vrot.slane %v976_v46, 2  ;;  %v1056_v17 = vmul.f32 0.663815, %v847_v41 }
 0x104   :  { %v2015_v21 = vmul.f32 %v1974_v12, %v1903_v23  ;;  %v1709_v11 = vadd.f32 %v1693_v32, %v1325_v5  ;;  %v1870_v55 = vsel %vm1861_vm2, %v1277_v45, %v1741_v29  ;;  %v1136_v13 = vrot.slane %v976_v46, 4 }
 0x105   :  { %v1886_v63 = vsel %vm852_vm1, %v1870_v55, %v1789_v49  ;;  %v960_v9 = vadd.f32 %v928_v58, %v880_v47  ;;  %v1088_v27 = vrot.slane %v1056_v17, 3  ;;  %v1184_v24 = vrot.slane %v896_v37, 5 }
 0x106   :  { %2032 = vst.msk [vmem:[#allocation5 + $0x24] sm:$0xf] %vm2022_vm3, %v2015_v21  ;;  %v1837_v48 = vrot.slane %v1709_v11, 3  ;;  %v1248_v39 = vrot.slane %v880_v47, 6  ;;  %v1296_v43 = vmul.f32 2.4738085e-06, %v864_v56 }
 0x107   :  { %v1376_v28 = vmul.f32 0.16552375, %v864_v56  ;;  %v1040_v60 = vadd.f32 %v1008_v35, %v960_v9  ;;  %v1456_v4 = vmul.f32 0.0025662559, %v864_v56  ;;  %v1600_v25 = vmul.f32 0.663815, %v864_v56 }
 0x108   :  { %v813_v5 = vrot.slane %v2880_v40, 5  ;;  %v1902_v3 = vsel %vm835_vm0, %v1886_v63, %v1837_v48  ;;  %v1328_v50 = vrot.slane %v1296_v43, 6  ;;  %v512_v41 = vmul.f32 0.663815, %v2766_v51 }
 0x109   :  { %v1408_v10 = vrot.slane %v1376_v28, 4  ;;  %v1552_v15 = vrot.slane %v1376_v28, 2  ;;  %v2014_v61 = vmul.f32 %v1969_v33, %v1902_v3  ;;  %v1120_v1 = vadd.f32 %v1088_v27, %v1040_v60  ;;  %v1984_v60 = vpop.permute.xlu1 %1983 }
 0x10a   :  { %v1488_v54 = vrot.slane %v1456_v4, 5  ;;  %v1632_v16 = vrot.slane %v1600_v25, 3  ;;  %v846_v0 = vsel %vm835_vm0, 0.0, %v813_v5  ;;  %v863_v59 = vsel %vm852_vm1, %v813_v5, 0.0 }
 0x10b   :  { %v1584_v52 = vadd.f32 %v1552_v15, %v960_v9  ;;  %2031 = vst.msk [vmem:[#allocation5 + $0x20] sm:$0xf] %vm2022_vm3, %v2014_v61  ;;  %v1168_v36 = vadd.f32 %v1136_v13, %v1120_v1  ;;  %v1440_v40 = vadd.f32 %v1408_v10, %v1120_v1  ;;  %v879_v19 = vmul.f32 2.4738085e-06, %v846_v0 }
 0x10c   :  { %v895_v20 = vmul.f32 0.0025662559, %v846_v0  ;;  %v975_v45 = vmul.f32 0.16552375, %v846_v0  ;;  %v1055_v2 = vmul.f32 0.663815, %v846_v0 }
 0x10d   :  { %v1664_v56 = vadd.f32 %v1632_v16, %v1584_v52  ;;  %v1295_v22 = vmul.f32 2.4738085e-06, %v863_v59  ;;  %v1216_v62 = vadd.f32 %v1184_v24, %v1168_v36  ;;  %v1520_v12 = vadd.f32 %v1488_v54, %v1440_v40 }
 0x10e   :  { %v927_v42 = vrot.slane %v895_v20, 1  ;;  %v1183_v47 = vrot.slane %v895_v20, 5  ;;  %v1007_v46 = vrot.slane %v975_v45, 2  ;;  %v1087_v53 = vrot.slane %v1055_v2, 3 }
 0x10f   :  { %v1680_v37 = vadd.f32 %v1664_v56, %v1408_v10  ;;  %v1135_v32 = vrot.slane %v975_v45, 4  ;;  %v1280_v29 = vadd.f32 %v1248_v39, %v1216_v62  ;;  %v1360_v51 = vadd.f32 %v1328_v50, %v1216_v62 }
 0x110   :  { %v1536_v49 = vadd.f32 %v1520_v12, %v1328_v50  ;;  %v959_v23 = vadd.f32 %v927_v42, %v879_v19  ;;  %v1247_v35 = vrot.slane %v879_v19, 6  ;;  %v1327_v17 = vrot.slane %v1295_v22, 6 }
 0x111   :  { %v1696_v58 = vadd.f32 %v1680_v37, %v1488_v54  ;;  %v1375_v21 = vmul.f32 0.16552375, %v863_v59  ;;  %v1744_v11 = vrot.slane %v1360_v51, 1  ;;  %v1455_v63 = vmul.f32 0.0025662559, %v863_v59 }
 0x112   :  { %v1792_v55 = vrot.slane %v1536_v49, 2  ;;  %v1039_v13 = vadd.f32 %v1007_v46, %v959_v23  ;;  %v1599_v33 = vmul.f32 0.663815, %v863_v59  ;;  %v513_v39 = vmul.f32 0.663815, %v2769_v44  ;;  %v1979_v49 = vpop.permute.xlu0 %1978 }
 0x113   :  { %v1712_v9 = vadd.f32 %v1696_v58, %v1328_v50  ;;  %v1407_v27 = vrot.slane %v1375_v21, 4  ;;  %v1551_v24 = vrot.slane %v1375_v21, 2  ;;  %v1873_v48 = vsel %vm1861_vm2, %v1280_v29, %v1744_v11 }
 0x114   :  { %v1119_v43 = vadd.f32 %v1087_v53, %v1039_v13  ;;  %v1487_v28 = vrot.slane %v1455_v63, 5  ;;  %v1889_v25 = vsel %vm852_vm1, %v1873_v48, %v1792_v55  ;;  %v1631_v3 = vrot.slane %v1599_v33, 3 }
 0x115   :  { %v1840_v4 = vrot.slane %v1712_v9, 3  ;;  %v1583_v5 = vadd.f32 %v1551_v24, %v959_v23  ;;  %v514_v61 = vmul.f32 0.663815, %v2772_v6  ;;  %v515_v50 = vmul.f32 0.663815, %v2775_v14 }
 0x116   :  { %v1167_v10 = vadd.f32 %v1135_v32, %v1119_v43  ;;  %v1439_v15 = vadd.f32 %v1407_v27, %v1119_v43  ;;  %v540_v16 = vadd.f32 %v512_v41, %v2859_v38  ;;  %v541_v52 = vadd.f32 %v513_v39, %v2862_v26 }
 0x117   :  { %v1905_v1 = vsel %vm835_vm0, %v1889_v25, %v1840_v4  ;;  %v1663_v54 = vadd.f32 %v1631_v3, %v1583_v5  ;;  %v542_v36 = vadd.f32 %v514_v61, %v2865_v57  ;;  %v543_v19 = vadd.f32 %v515_v50, %v2868_v30 }
 0x118   :  { %v2017_v44 = vmul.f32 %v1984_v60, %v1905_v1  ;;  %v1215_v0 = vadd.f32 %v1183_v47, %v1167_v10  ;;  %v1519_v59 = vadd.f32 %v1487_v28, %v1439_v15  ;;  %v660_v20 = vmul.f32 0.0025662559, %v2886_v31 }
 0x119   :  { %v1679_v40 = vadd.f32 %v1663_v54, %v1407_v27  ;;  %v684_v6 = vmul.f32 0.16552375, %v2888_v7  ;;  %v662_v38 = vmul.f32 0.0025662559, %v542_v36  ;;  %v685_v26 = vmul.f32 0.16552375, %v541_v52 }
 0x11a   :  { %2034 = vst.msk [vmem:[#allocation5 + $0x2c] sm:$0xf] %vm2022_vm3, %v2017_v44  ;;  %v1279_v14 = vadd.f32 %v1247_v35, %v1215_v0  ;;  %v1359_v56 = vadd.f32 %v1327_v17, %v1215_v0  ;;  %v1535_v45 = vadd.f32 %v1519_v59, %v1327_v17  ;;  %v712_v22 = vmul.f32 0.663815, %v540_v16 }
 0x11b   :  { %v1695_v41 = vadd.f32 %v1679_v40, %v1487_v28  ;;  %v696_v2 = vadd.f32 %v684_v6, %v660_v20  ;;  %v770_v57 = vmul.f32 2.4738085e-06, %v543_v19  ;;  %v649_v42 = vmul.f32 2.4738085e-06, %v2888_v7 }
 0x11c   :  { %v1743_v62 = vrot.slane %v1359_v56, 1  ;;  %v1791_v12 = vrot.slane %v1535_v45, 2  ;;  %v650_v37 = vmul.f32 2.4738085e-06, %v541_v52  ;;  %v661_v46 = vmul.f32 0.0025662559, %v540_v16 }
 0x11d   :  { %v1711_v30 = vadd.f32 %v1695_v41, %v1327_v17  ;;  %v728_v47 = vadd.f32 %v712_v22, %v696_v2  ;;  %v711_v32 = vmul.f32 0.663815, %v2886_v31  ;;  %v488_v29 = vadd.f32 %v2836_v18, %v2874_v34 }
 0x11e   :  { %v1872_v53 = vsel %vm1861_vm2, %v1279_v14, %v1743_v62  ;;  %v516_v51 = vmul.f32 0.663815, %v2845_v8  ;;  %v673_v21 = vadd.f32 %v661_v46, %v649_v42  ;;  %v674_v11 = vadd.f32 %v662_v38, %v650_v37 }
 0x11f   :  { %v1839_v23 = vrot.slane %v1711_v30, 3  ;;  %v1888_v58 = vsel %vm852_vm1, %v1872_v53, %v1791_v12  ;;  %v744_v35 = vadd.f32 %v728_v47, %v685_v26  ;;  %v743_v7 = vadd.f32 %v711_v32, %v684_v6 }
 0x120   :  { %v544_v17 = vadd.f32 %v516_v51, %v488_v29  ;;  %v686_v55 = vmul.f32 0.16552375, %v543_v19  ;;  %v697_v9 = vadd.f32 %v685_v26, %v673_v21  ;;  %v713_v31 = vmul.f32 0.663815, %v542_v36 }
 0x121   :  { %v1904_v13 = vsel %vm835_vm0, %v1888_v58, %v1839_v23  ;;  %v764_v63 = vadd.f32 %v744_v35, %v662_v38  ;;  %v763_v24 = vadd.f32 %v743_v7, %v661_v46 }
 0x122   :  { %v2016_v27 = vmul.f32 %v1979_v49, %v1904_v13  ;;  %v698_v18 = vadd.f32 %v686_v55, %v674_v11  ;;  %v714_v34 = vmul.f32 0.663815, %v544_v17  ;;  %v729_v28 = vadd.f32 %v713_v31, %v697_v9 }
 0x123   :  { %v784_v8 = vadd.f32 %v770_v57, %v764_v63  ;;  %v783_v33 = vadd.f32 %v763_v24, %v650_v37  ;;  %v750_v25 = vmul.f32 0.0025662559, %v544_v17 }
 0x124   :  { %2033 = vst.msk [vmem:[#allocation5 + $0x28] sm:$0xf] %vm2022_vm3, %v2016_v27  ;;  %v2929_v43 = vadd.f32 %v714_v34, %v698_v18  ;;  %v745_v52 = vadd.f32 %v729_v28, %v686_v55 }
 0x125   :  { %v816_v48 = vrot.slane %v784_v8, 5  ;;  %v815_v4 = vrot.slane %v783_v33, 5 }
 0x126   :  { %v818_v16 = vrot.slane %v2929_v43, 5  ;;  %v2939_v42 = vadd.f32 %v750_v25, %v745_v52 }
 0x127   :  { %v849_v39 = vsel %vm835_vm0, 0.0, %v816_v48  ;;  %v866_v60 = vsel %vm852_vm1, %v816_v48, 0.0  ;;  %v848_v45 = vsel %vm835_vm0, 0.0, %v815_v4  ;;  %v865_v38 = vsel %vm852_vm1, %v815_v4, 0.0 }
 0x128   :  { %v882_v5 = vmul.f32 2.4738085e-06, %v849_v39  ;;  %v898_v3 = vmul.f32 0.0025662559, %v849_v39  ;;  %v978_v10 = vmul.f32 0.16552375, %v849_v39 }
 0x129   :  { %v1058_v15 = vmul.f32 0.663815, %v849_v39  ;;  %v1298_v61 = vmul.f32 2.4738085e-06, %v866_v60  ;;  %v1378_v50 = vmul.f32 0.16552375, %v866_v60 }
 0x12a   :  { %v930_v1 = vrot.slane %v898_v3, 1  ;;  %v1010_v54 = vrot.slane %v978_v10, 2  ;;  %v1138_v0 = vrot.slane %v978_v10, 4  ;;  %v1186_v59 = vrot.slane %v898_v3, 5 }
 0x12b   :  { %v1090_v44 = vrot.slane %v1058_v15, 3  ;;  %v1250_v36 = vrot.slane %v882_v5, 6  ;;  %v1458_v19 = vmul.f32 0.0025662559, %v866_v60  ;;  %v1554_v20 = vrot.slane %v1378_v50, 2 }
 0x12c   :  { %v962_v40 = vadd.f32 %v930_v1, %v882_v5  ;;  %v1602_v6 = vmul.f32 0.663815, %v866_v60  ;;  %v1330_v14 = vrot.slane %v1298_v61, 6  ;;  %v1410_v56 = vrot.slane %v1378_v50, 4 }
 0x12d   :  { %v851_v22 = vsel %vm835_vm0, 0.0, %v818_v16  ;;  %v881_v62 = vmul.f32 2.4738085e-06, %v848_v45  ;;  %v897_v12 = vmul.f32 0.0025662559, %v848_v45  ;;  %v1490_v47 = vrot.slane %v1458_v19, 5 }
 0x12e   :  { %v1042_v41 = vadd.f32 %v1010_v54, %v962_v40  ;;  %v1586_v26 = vadd.f32 %v1554_v20, %v962_v40  ;;  %v1634_v2 = vrot.slane %v1602_v6, 3  ;;  %v977_v57 = vmul.f32 0.16552375, %v848_v45  ;;  %v1994_v54 = vpop.permute.xlu1 %1993 }
 0x12f   :  { %v1057_v46 = vmul.f32 0.663815, %v848_v45  ;;  %v929_v53 = vrot.slane %v897_v12, 1  ;;  %v1297_v51 = vmul.f32 2.4738085e-06, %v865_v38  ;;  %v1185_v35 = vrot.slane %v897_v12, 5 }
 0x130   :  { %v1122_v30 = vadd.f32 %v1090_v44, %v1042_v41  ;;  %v1666_v37 = vadd.f32 %v1634_v2, %v1586_v26  ;;  %v1009_v32 = vrot.slane %v977_v57, 2  ;;  %v1137_v29 = vrot.slane %v977_v57, 4 }
 0x131   :  { %v961_v21 = vadd.f32 %v929_v53, %v881_v62  ;;  %v1089_v7 = vrot.slane %v1057_v46, 3  ;;  %v1249_v17 = vrot.slane %v881_v62, 6  ;;  %v1377_v11 = vmul.f32 0.16552375, %v865_v38 }
 0x132   :  { %v1170_v49 = vadd.f32 %v1138_v0, %v1122_v30  ;;  %v1442_v23 = vadd.f32 %v1410_v56, %v1122_v30  ;;  %v1682_v58 = vadd.f32 %v1666_v37, %v1410_v56  ;;  %v1457_v9 = vmul.f32 0.0025662559, %v865_v38 }
 0x133   :  { %v1041_v31 = vadd.f32 %v1009_v32, %v961_v21  ;;  %v1409_v27 = vrot.slane %v1377_v11, 4  ;;  %v1553_v24 = vrot.slane %v1377_v11, 2  ;;  %v1601_v18 = vmul.f32 0.663815, %v865_v38 }
 0x134   :  { %v1218_v55 = vadd.f32 %v1186_v59, %v1170_v49  ;;  %v1522_v13 = vadd.f32 %v1490_v47, %v1442_v23  ;;  %v1698_v63 = vadd.f32 %v1682_v58, %v1490_v47  ;;  %v1489_v39 = vrot.slane %v1457_v9, 5  ;;  %v1989_v58 = vpop.permute.xlu0 %1988 }
 0x135   :  { %v1121_v28 = vadd.f32 %v1089_v7, %v1041_v31  ;;  %v1585_v60 = vadd.f32 %v1553_v24, %v961_v21  ;;  %v1633_v4 = vrot.slane %v1601_v18, 3  ;;  %v1329_v10 = vrot.slane %v1297_v51, 6 }
 0x136   :  { %v1282_v34 = vadd.f32 %v1250_v36, %v1218_v55  ;;  %v1362_v8 = vadd.f32 %v1330_v14, %v1218_v55  ;;  %v1538_v33 = vadd.f32 %v1522_v13, %v1330_v14  ;;  %v1714_v48 = vadd.f32 %v1698_v63, %v1330_v14 }
 0x137   :  { %v1169_v15 = vadd.f32 %v1137_v29, %v1121_v28  ;;  %v1441_v61 = vadd.f32 %v1409_v27, %v1121_v28  ;;  %v1665_v50 = vadd.f32 %v1633_v4, %v1585_v60  ;;  %v900_v1 = vmul.f32 0.0025662559, %v851_v22 }
 0x138   :  { %v1746_v25 = vrot.slane %v1362_v8, 1  ;;  %v1794_v5 = vrot.slane %v1538_v33, 2  ;;  %v1842_v3 = vrot.slane %v1714_v48, 3  ;;  %v884_v44 = vmul.f32 2.4738085e-06, %v851_v22 }
 0x139   :  { %v980_v0 = vmul.f32 0.16552375, %v851_v22  ;;  %v1060_v59 = vmul.f32 0.663815, %v851_v22  ;;  %v1217_v40 = vadd.f32 %v1185_v35, %v1169_v15  ;;  %v1521_v19 = vadd.f32 %v1489_v39, %v1441_v61 }
 0x13a   :  { %v1875_v52 = vsel %vm1861_vm2, %v1282_v34, %v1746_v25  ;;  %v1681_v20 = vadd.f32 %v1665_v50, %v1409_v27  ;;  %v868_v14 = vsel %vm852_vm1, %v818_v16, 0.0  ;;  %v932_v56 = vrot.slane %v900_v1, 1 }
 0x13b   :  { %v1891_v36 = vsel %vm852_vm1, %v1875_v52, %v1794_v5  ;;  %v1012_v45 = vrot.slane %v980_v0, 2  ;;  %v1281_v41 = vadd.f32 %v1249_v17, %v1217_v40  ;;  %v1361_v26 = vadd.f32 %v1329_v10, %v1217_v40 }
 0x13c   :  { %v1907_v6 = vsel %vm835_vm0, %v1891_v36, %v1842_v3  ;;  %v1537_v2 = vadd.f32 %v1521_v19, %v1329_v10  ;;  %v1697_v62 = vadd.f32 %v1681_v20, %v1489_v39  ;;  %v964_v12 = vadd.f32 %v932_v56, %v884_v44  ;;  %v2004_v56 = vpop.permute.xlu1 %2003 }
 0x13d   :  { %v2019_v38 = vmul.f32 %v1994_v54, %v1907_v6  ;;  %v1092_v22 = vrot.slane %v1060_v59, 3  ;;  %v1140_v57 = vrot.slane %v980_v0, 4  ;;  %v1745_v30 = vrot.slane %v1361_v26, 1 }
 0x13e   :  { %v1793_v47 = vrot.slane %v1537_v2, 2  ;;  %v1300_v37 = vmul.f32 2.4738085e-06, %v868_v14  ;;  %v1380_v46 = vmul.f32 0.16552375, %v868_v14  ;;  %v1713_v53 = vadd.f32 %v1697_v62, %v1329_v10 }
 0x13f   :  { %2036 = vst.msk [vmem:[#allocation5 + $0x34] sm:$0xf] %vm2022_vm3, %v2019_v38  ;;  %v1044_v43 = vadd.f32 %v1012_v45, %v964_v12  ;;  %v1460_v32 = vmul.f32 0.0025662559, %v868_v14  ;;  %v1604_v16 = vmul.f32 0.663815, %v868_v14  ;;  %v1874_v29 = vsel %vm1861_vm2, %v1281_v41, %v1745_v30 }
 0x140   :  { %v1188_v51 = vrot.slane %v900_v1, 5  ;;  %v1412_v49 = vrot.slane %v1380_v46, 4  ;;  %v1556_v23 = vrot.slane %v1380_v46, 2  ;;  %v1841_v35 = vrot.slane %v1713_v53, 3 }
 0x141   :  { %v1890_v21 = vsel %vm852_vm1, %v1874_v29, %v1793_v47  ;;  %v1124_v7 = vadd.f32 %v1092_v22, %v1044_v43  ;;  %v1492_v17 = vrot.slane %v1460_v32, 5  ;;  %v1252_v11 = vrot.slane %v884_v44, 6 }
 0x142   :  { %v1588_v55 = vadd.f32 %v1556_v23, %v964_v12  ;;  %v1636_v13 = vrot.slane %v1604_v16, 3  ;;  %v817_v63 = vrot.slane %v2939_v42, 5  ;;  %v1906_v9 = vsel %vm835_vm0, %v1890_v21, %v1841_v35 }
 0x143   :  { %v1172_v31 = vadd.f32 %v1140_v57, %v1124_v7  ;;  %v1332_v27 = vrot.slane %v1300_v37, 6  ;;  %v1444_v24 = vadd.f32 %v1412_v49, %v1124_v7  ;;  %v2018_v18 = vmul.f32 %v1989_v58, %v1906_v9 }
 0x144   :  { %v1668_v34 = vadd.f32 %v1636_v13, %v1588_v55  ;;  %v850_v8 = vsel %vm835_vm0, 0.0, %v817_v63  ;;  %v867_v4 = vsel %vm852_vm1, %v817_v63, 0.0  ;;  %v1999_v55 = vpop.permute.xlu0 %1998 }
 0x145   :  { %v1220_v33 = vadd.f32 %v1188_v51, %v1172_v31  ;;  %v1524_v48 = vadd.f32 %v1492_v17, %v1444_v24  ;;  %v883_v28 = vmul.f32 2.4738085e-06, %v850_v8  ;;  %v899_v39 = vmul.f32 0.0025662559, %v850_v8  ;;  %2035 = vst.msk [vmem:[#allocation5 + $0x30] sm:$0xf] %vm2022_vm3, %v2018_v18 }
 0x146   :  { %v1684_v60 = vadd.f32 %v1668_v34, %v1412_v49  ;;  %v979_v25 = vmul.f32 0.16552375, %v850_v8  ;;  %v1059_v42 = vmul.f32 0.663815, %v850_v8  ;;  %v1299_v36 = vmul.f32 2.4738085e-06, %v867_v4 }
 0x147   :  { %v1284_v5 = vadd.f32 %v1252_v11, %v1220_v33  ;;  %v1364_v3 = vadd.f32 %v1332_v27, %v1220_v33  ;;  %v1540_v10 = vadd.f32 %v1524_v48, %v1332_v27  ;;  %v931_v15 = vrot.slane %v899_v39, 1 }
 0x148   :  { %v1700_v61 = vadd.f32 %v1684_v60, %v1492_v17  ;;  %v1011_v50 = vrot.slane %v979_v25, 2  ;;  %v1091_v44 = vrot.slane %v1059_v42, 3  ;;  %v1139_v59 = vrot.slane %v979_v25, 4 }
 0x149   :  { %v1748_v1 = vrot.slane %v1364_v3, 1  ;;  %v1796_v54 = vrot.slane %v1540_v10, 2  ;;  %v963_v52 = vadd.f32 %v931_v15, %v883_v28  ;;  %v1379_v40 = vmul.f32 0.16552375, %v867_v4 }
 0x14a   :  { %v1716_v0 = vadd.f32 %v1700_v61, %v1332_v27  ;;  %v1459_v6 = vmul.f32 0.0025662559, %v867_v4  ;;  %v1603_v14 = vmul.f32 0.663815, %v867_v4  ;;  %v1187_v62 = vrot.slane %v899_v39, 5 }
 0x14b   :  { %v1877_v19 = vsel %vm1861_vm2, %v1284_v5, %v1748_v1  ;;  %v1043_v20 = vadd.f32 %v1011_v50, %v963_v52  ;;  %v1411_v41 = vrot.slane %v1379_v40, 4  ;;  %v1555_v26 = vrot.slane %v1379_v40, 2 }
 0x14c   :  { %v1844_v45 = vrot.slane %v1716_v0, 3  ;;  %v1893_v38 = vsel %vm852_vm1, %v1877_v19, %v1796_v54  ;;  %v1491_v12 = vrot.slane %v1459_v6, 5  ;;  %v1635_v22 = vrot.slane %v1603_v14, 3 }
 0x14d   :  { %v1123_v2 = vadd.f32 %v1091_v44, %v1043_v20  ;;  %v1251_v30 = vrot.slane %v883_v28, 6  ;;  %v1587_v47 = vadd.f32 %v1555_v26, %v963_v52  ;;  %v1331_v53 = vrot.slane %v1299_v36, 6 }
 0x14e   :  { %v1909_v57 = vsel %vm835_vm0, %v1893_v38, %v1844_v45 }
 0x14f   :  { %v2021_v37 = vmul.f32 %v2004_v56, %v1909_v57  ;;  %v1171_v46 = vadd.f32 %v1139_v59, %v1123_v2  ;;  %v1443_v43 = vadd.f32 %v1411_v41, %v1123_v2  ;;  %v1667_v32 = vadd.f32 %v1635_v22, %v1587_v47 }
 0x151   :  { %2038 = vst.msk [vmem:[#allocation5 + $0x3c] sm:$0xf] %vm2022_vm3, %v2021_v37  ;;  %v1219_v16 = vadd.f32 %v1187_v62, %v1171_v46  ;;  %v1523_v29 = vadd.f32 %v1491_v12, %v1443_v43  ;;  %v1683_v51 = vadd.f32 %v1667_v32, %v1411_v41 }
 0x153   :  { %v1283_v49 = vadd.f32 %v1251_v30, %v1219_v16  ;;  %v1363_v23 = vadd.f32 %v1331_v53, %v1219_v16  ;;  %v1539_v58 = vadd.f32 %v1523_v29, %v1331_v53  ;;  %v1699_v35 = vadd.f32 %v1683_v51, %v1491_v12 }
 0x155   :  { %v1747_v21 = vrot.slane %v1363_v23, 1  ;;  %v1795_v7 = vrot.slane %v1539_v58, 2  ;;  %v1715_v17 = vadd.f32 %v1699_v35, %v1331_v53 }
 0x157   :  { %v1876_v11 = vsel %vm1861_vm2, %v1283_v49, %v1747_v21  ;;  %v1843_v13 = vrot.slane %v1715_v17, 3 }
 0x158   :  { %v1892_v63 = vsel %vm852_vm1, %v1876_v11, %v1795_v7 }
 0x159   :  { %v1908_v9 = vsel %vm835_vm0, %v1892_v63, %v1843_v13 }
 0x15a   :  { %v2020_v31 = vmul.f32 %v1999_v55, %v1908_v9 }
 0x15c   :  { %2037 = vst.msk [vmem:[#allocation5 + $0x38] sm:$0xf] %vm2022_vm3, %v2020_v31 }
 0x15d   :  { %2096 = shalt.err (!%p2093_p9)
}
 0x15e   :  { %s2114_s21 = smov 64   ;;  %s2115_s0 = smov 4  }
 0x15f   :  { %2050 = dma.vmem_to_hbm [thread:$0]  %s2045_s19, 1024, %s2968_s2, [#allocation4], %s2114_s21, %s2114_s21, %s2115_s0  }
 0x160   :  { %2107 = dma.done.wait [#allocation4], 1024  }
 0x161   :  { %2108 = vsyncadd [#allocation4], 4294966272 }
 0x162   :  { %2054 = vsyncpa [#allocation3], 1 }
 0x163   :  { %2055 = vsyncpa [#allocation4], 1 }

</bundles_post_ra>
